<compile_context>
chip_gen: v5e
topology: v5e:2x2
jax: 0.10.0
libtpu: 0.0.40
codegen_flags: <defaults>
</compile_context>

<pallas_src>
import functools

import jax
import jax.numpy as jnp
import numpy as np
from jax.experimental import pallas as pl
from jax.experimental.pallas import tpu as pltpu


# ----------------------------------------------------------------------------
# Pallas kernel
# ----------------------------------------------------------------------------
def _bilstm_para_kernel(x_ref, wih_ref, whh_f_ref, whh_b_ref, b_ref, out_ref,
                        *, seq_len):
    """Fused bidirectional LSTM final-state kernel.

    x_ref     : (T*Bp, D)  bf16, time-major flattened (row = t*Bp + b), Bp = padded batch
    wih_ref   : (D, 8H)    bf16, columns = [fwd (i,f,g,o) | bwd (i,f,g,o)]
    whh_f_ref : (H, 4H)    bf16, forward recurrent weights, (i,f,g,o) columns
    whh_b_ref : (H, 4H)    bf16, backward recurrent weights
    b_ref     : (1, 8H)    f32,  combined biases (b_ih + b_hh) per direction
    out_ref   : (Bp, 2H)   f32,  concat(h_fwd_final, h_bwd_final)
    """
    TB, _ = x_ref.shape
    T = seq_len
    B = TB // T                 # padded batch (multiple of 8)
    G8 = wih_ref.shape[1]       # 8H
    G4 = G8 // 2                # 4H
    H = G4 // 4
    f32 = jnp.float32
    bf16 = jnp.bfloat16

    # ---- Hoisted input projection: ONE big MXU matmul (bf16 -> f32 acc).
    # gx rows [t*B:(t+1)*B] belong to timestep t; cols [:4H] are the forward
    # direction's (i,f,g,o) pre-activations, cols [4H:] the backward ones.
    # TODO(synk): at production T/B store gx in bf16 (or stream per timestep
    # via a grid + pl.Buffered) instead of keeping the full f32 buffer live.
    gx = jnp.dot(x_ref[...], wih_ref[...], preferred_element_type=f32) + b_ref[...]

    whh_f = whh_f_ref[...]      # (H, 4H)
    whh_b = whh_b_ref[...]      # (H, 4H)

    def sig(v):
        # Single-EUP sigmoid: sigmoid(x) = 0.5*tanh(0.5*x) + 0.5.
        return 0.5 * jnp.tanh(0.5 * v) + 0.5

    def half_step(gates, c):
        # gates: (B, 4H) pre-activations for one direction, PyTorch (i,f,g,o).
        i = sig(gates[:, 0 * H:1 * H])
        f = sig(gates[:, 1 * H:2 * H])
        g = jnp.tanh(gates[:, 2 * H:3 * H])
        o = sig(gates[:, 3 * H:4 * H])
        c_new = f * c + i * g
        h_new = o * jnp.tanh(c_new)
        return h_new, c_new

    zeros = jnp.zeros((B, H), f32)
    h_f, c_f = zeros, zeros
    h_b, c_b = zeros, zeros

    # ---- Fused fwd/bwd recurrence, fully unrolled (T is small and static).
    # Two independent per-direction (B,H)@(H,4H) MXU matmuls per step
    # (no half-zero weight streaming, no per-step h concat / repack).
    for t in range(T):
        row_f = t * B               # forward direction consumes x[t]
        row_b = (T - 1 - t) * B     # backward direction consumes x[T-1-t]
        if t == 0:
            # h0 = c0 = 0  ->  recurrent term vanishes; skip the first matmuls.
            g_fwd = gx[row_f:row_f + B, :G4]
            g_bwd = gx[row_b:row_b + B, G4:]
        else:
            gh_f = jnp.dot(h_f.astype(bf16), whh_f, preferred_element_type=f32)
            gh_b = jnp.dot(h_b.astype(bf16), whh_b, preferred_element_type=f32)
            g_fwd = gh_f + gx[row_f:row_f + B, :G4]
            g_bwd = gh_b + gx[row_b:row_b + B, G4:]
        h_f, c_f = half_step(g_fwd, c_f)
        h_b, c_b = half_step(g_bwd, c_b)

    # para_embed = cat(outputs[:, -1, :H], outputs[:, 0, H:]); one dense store.
    out_ref[...] = jnp.concatenate([h_f, h_b], axis=1)


# ----------------------------------------------------------------------------
# One-time weight preparation (hoisted out of the forward path; cache the
# result — at H=512 this is ~16-24 MiB of weight shuffling per call otherwise).
# ----------------------------------------------------------------------------
def prepare_params(params):
    bf16 = jnp.bfloat16
    # Fused input weights / biases: [fwd (i,f,g,o) | bwd (i,f,g,o)] columns.
    wih_cat = jnp.concatenate([params["wih_f"], params["wih_b"]], axis=1)   # (D, 8H)
    # NOTE: b_* must already be the per-direction sum b_ih + b_hh (both zero
    # under this module's init); sum them here if a checkpoint carries both.
    b_cat = jnp.concatenate([params["b_f"], params["b_b"]], axis=1)         # (1, 8H)
    return {
        "wih_cat": wih_cat.astype(bf16),            # (D, 8H)
        "whh_f": params["whh_f"].astype(bf16),      # (H, 4H)
        "whh_b": params["whh_b"].astype(bf16),      # (H, 4H)
        "b_cat": b_cat.astype(jnp.float32),         # (1, 8H)
    }


# ----------------------------------------------------------------------------
# Wrapper: per-call layout plumbing (pad batch to 8 sublanes, time-major
# flatten, bf16 cast of x).
# ----------------------------------------------------------------------------
def para_encoder_for_context(x, prepared):
    B, T, D = x.shape
    G8 = prepared["wih_cat"].shape[1]
    H = G8 // 8
    H2 = 2 * H

    # Pad batch to a multiple of 8 so every per-step gx row slab is
    # 8-sublane-tile aligned and (B, .) VPU/EUP ops use full sublanes.
    B_pad = max(8, ((B + 7) // 8) * 8)

    # Time-major flattened input: row = t*B_pad + b, so every timestep is a
    # static contiguous, tile-aligned row slab inside the kernel.
    # TODO(synk): at production B/T avoid this HBM-level transpose by doing
    # the re-layout when writing gx into a VMEM scratch inside the kernel.
    x_tm = jnp.transpose(x, (1, 0, 2))                       # (T, B, D)
    if B_pad != B:
        x_tm = jnp.pad(x_tm, ((0, 0), (0, B_pad - B), (0, 0)))
    x_tm = x_tm.reshape(T * B_pad, D).astype(jnp.bfloat16)

    kernel = functools.partial(_bilstm_para_kernel, seq_len=T)
    # NOTE: grid=() at this toy shape (a grid would be pure overhead).  For
    # production B/T: grid over the batch (dimension_semantics=("parallel",),
    # shards across v7x's 2 TensorCores), stream/bf16 the gx buffer, and set
    # vmem_limit_bytes (v5e's 16 MiB default scoped VMEM is too small for
    # H=512, D=3072 weights; v7x physical VMEM is 64 MiB, half of v5e/v6e).
    out = pl.pallas_call(
        kernel,
        out_shape=jax.ShapeDtypeStruct((B_pad, H2), jnp.float32),
        in_specs=[pl.BlockSpec(memory_space=pltpu.MemorySpace.VMEM)] * 5,
        out_specs=pl.BlockSpec(memory_space=pltpu.MemorySpace.VMEM),
    )(x_tm, prepared["wih_cat"], prepared["whh_f"], prepared["whh_b"],
      prepared["b_cat"])
    return out[:B]


# ----------------------------------------------------------------------------
# Deterministic parameter init mirroring the module's __init__:
#   weights: orthogonal init, biases: zeros.
# ----------------------------------------------------------------------------
def _orthogonal(key, shape):
    rows, cols = shape
    n = max(rows, cols)
    a = jax.random.normal(key, (n, n), dtype=jnp.float32)
    q, r = jnp.linalg.qr(a)
    d = jnp.diagonal(r)
    q = q * jnp.where(d == 0, 1.0, jnp.sign(d))[None, :]
    return q[:rows, :cols]


def init_params(key, input_dim, hidden_size):
    D, H = input_dim, hidden_size
    k = jax.random.split(key, 4)
    # PyTorch stores weight_ih_l0 as (4H, D), weight_hh_l0 as (4H, H); we
    # pre-transpose so the kernel computes x @ W / h @ W directly.
    w_ih_f = _orthogonal(k[0], (4 * H, D))
    w_hh_f = _orthogonal(k[1], (4 * H, H))
    w_ih_b = _orthogonal(k[2], (4 * H, D))
    w_hh_b = _orthogonal(k[3], (4 * H, H))
    zeros_b = jnp.zeros((1, 4 * H), jnp.float32)   # b_ih + b_hh, both zero
    return {
        "wih_f": jnp.asarray(w_ih_f.T),   # (D, 4H)
        "whh_f": jnp.asarray(w_hh_f.T),   # (H, 4H)
        "b_f": zeros_b,
        "wih_b": jnp.asarray(w_ih_b.T),
        "whh_b": jnp.asarray(w_hh_b.T),
        "b_b": zeros_b,
    }


# ----------------------------------------------------------------------------
# Pure-JAX reference (plain two-direction recurrence, separate weights).
# It mirrors the kernel's bf16 matmul operands (f32 accumulate), so the only
# deviation from full-f32 PyTorch semantics is the bf16 rounding of the
# matmul inputs — the structural transforms (hoist / per-direction split /
# batch pad) are checked exactly against the straightforward formulation.
# ----------------------------------------------------------------------------
def reference_forward(x, params):
    B, T, D = x.shape
    H = params["whh_f"].shape[0]
    bf16 = jnp.bfloat16

    def cell(xt, h, c, wih, whh, b):
        gates = (jnp.dot(xt.astype(bf16), wih.astype(bf16),
                         preferred_element_type=jnp.float32)
                 + jnp.dot(h.astype(bf16), whh.astype(bf16),
                           preferred_element_type=jnp.float32)
                 + b)
        i = jax.nn.sigmoid(gates[:, 0 * H:1 * H])
        f = jax.nn.sigmoid(gates[:, 1 * H:2 * H])
        g = jnp.tanh(gates[:, 2 * H:3 * H])
        o = jax.nn.sigmoid(gates[:, 3 * H:4 * H])
        c = f * c + i * g
        h = o * jnp.tanh(c)
        return h, c

    h = c = jnp.zeros((B, H), jnp.float32)
    for t in range(T):
        h, c = cell(x[:, t, :], h, c, params["wih_f"], params["whh_f"], params["b_f"])
    h_fwd = h
    h = c = jnp.zeros((B, H), jnp.float32)
    for t in range(T - 1, -1, -1):
        h, c = cell(x[:, t, :], h, c, params["wih_b"], params["whh_b"], params["b_b"])
    h_bwd = h
    return jnp.concatenate([h_fwd, h_bwd], axis=1)


if __name__ == "__main__":
    B, T, D, H = 2, 8, 32, 32     # small shapes consistent with the module
    key = jax.random.PRNGKey(0)
    kx, kp = jax.random.split(key)
    x = jax.random.normal(kx, (B, T, D), dtype=jnp.float32)
    params = init_params(kp, input_dim=D, hidden_size=H)

    prepared = prepare_params(params)          # one-time weight fusion / cast
    out = para_encoder_for_context(x, prepared)
    out = jax.block_until_ready(out)

    ref = reference_forward(x, params)
    np.testing.assert_allclose(np.asarray(out), np.asarray(ref), rtol=5e-3, atol=5e-3)
    assert out.shape == (B, 2 * H)
    print("KERNEL_OK")
</pallas_src>

<mosaic_0001>
module attributes {stable_mosaic.version = 11 : i64} {
  func.func @_bilstm_para_kernel(%arg0: memref<64x32xbf16, #tpu.memory_space<vmem>>, %arg1: memref<32x256xbf16, #tpu.memory_space<vmem>>, %arg2: memref<32x128xbf16, #tpu.memory_space<vmem>>, %arg3: memref<32x128xbf16, #tpu.memory_space<vmem>>, %arg4: memref<1x256xf32, #tpu.memory_space<vmem>>, %arg5: memref<8x64xf32, #tpu.memory_space<vmem>>) attributes {dimension_semantics = [], scalar_prefetch = 0 : i64, scratch_operands = 0 : i64, tpu.core_type = #tpu.core_type<tc>} {
    %c0 = arith.constant 0 : index
    %c0_0 = arith.constant 0 : index
    %0 = vector.load %arg0[%c0, %c0_0] : memref<64x32xbf16, #tpu.memory_space<vmem>>, vector<64x32xbf16>
    %c0_1 = arith.constant 0 : index
    %c0_2 = arith.constant 0 : index
    %1 = vector.load %arg1[%c0_1, %c0_2] : memref<32x256xbf16, #tpu.memory_space<vmem>>, vector<32x256xbf16>
    %cst = arith.constant dense<0.000000e+00> : vector<64x256xf32>
    %2 = tpu.matmul %0, %1, %cst {dimension_numbers = #tpu.dot_dimension_numbers<[1], [0], [0], [1], [0, 0, 1, 1], [], []>} : vector<64x32xbf16>, vector<32x256xbf16>, vector<64x256xf32> -> vector<64x256xf32>
    %c0_3 = arith.constant 0 : index
    %c0_4 = arith.constant 0 : index
    %3 = vector.load %arg4[%c0_3, %c0_4] : memref<1x256xf32, #tpu.memory_space<vmem>>, vector<1x256xf32>
    %4 = vector.broadcast %3 : vector<1x256xf32> to vector<64x256xf32>
    %5 = arith.addf %2, %4 : vector<64x256xf32>
    %c0_5 = arith.constant 0 : index
    %c0_6 = arith.constant 0 : index
    %6 = vector.load %arg2[%c0_5, %c0_6] : memref<32x128xbf16, #tpu.memory_space<vmem>>, vector<32x128xbf16>
    %c0_7 = arith.constant 0 : index
    %c0_8 = arith.constant 0 : index
    %7 = vector.load %arg3[%c0_7, %c0_8] : memref<32x128xbf16, #tpu.memory_space<vmem>>, vector<32x128xbf16>
    %cst_9 = arith.constant 0.000000e+00 : f32
    %8 = vector.broadcast %cst_9 : f32 to vector<8x32xf32>
    %9 = vector.extract_strided_slice %5 {offsets = [0, 0], sizes = [8, 128], strides = [1, 1]} : vector<64x256xf32> to vector<8x128xf32>
    %10 = vector.extract_strided_slice %5 {offsets = [56, 128], sizes = [8, 128], strides = [1, 1]} : vector<64x256xf32> to vector<8x128xf32>
    %11 = vector.extract_strided_slice %9 {offsets = [0, 0], sizes = [8, 32], strides = [1, 1]} : vector<8x128xf32> to vector<8x32xf32>
    %cst_10 = arith.constant 5.000000e-01 : f32
    %12 = vector.broadcast %cst_10 : f32 to vector<8x32xf32>
    %13 = arith.mulf %12, %11 : vector<8x32xf32>
    %14 = math.tanh %13 : vector<8x32xf32>
    %cst_11 = arith.constant 5.000000e-01 : f32
    %15 = vector.broadcast %cst_11 : f32 to vector<8x32xf32>
    %16 = arith.mulf %15, %14 : vector<8x32xf32>
    %cst_12 = arith.constant 5.000000e-01 : f32
    %17 = vector.broadcast %cst_12 : f32 to vector<8x32xf32>
    %18 = arith.addf %16, %17 : vector<8x32xf32>
    %19 = vector.extract_strided_slice %9 {offsets = [0, 32], sizes = [8, 32], strides = [1, 1]} : vector<8x128xf32> to vector<8x32xf32>
    %cst_13 = arith.constant 5.000000e-01 : f32
    %20 = vector.broadcast %cst_13 : f32 to vector<8x32xf32>
    %21 = arith.mulf %20, %19 : vector<8x32xf32>
    %22 = math.tanh %21 : vector<8x32xf32>
    %cst_14 = arith.constant 5.000000e-01 : f32
    %23 = vector.broadcast %cst_14 : f32 to vector<8x32xf32>
    %24 = arith.mulf %23, %22 : vector<8x32xf32>
    %cst_15 = arith.constant 5.000000e-01 : f32
    %25 = vector.broadcast %cst_15 : f32 to vector<8x32xf32>
    %26 = arith.addf %24, %25 : vector<8x32xf32>
    %27 = vector.extract_strided_slice %9 {offsets = [0, 64], sizes = [8, 32], strides = [1, 1]} : vector<8x128xf32> to vector<8x32xf32>
    %28 = math.tanh %27 : vector<8x32xf32>
    %29 = vector.extract_strided_slice %9 {offsets = [0, 96], sizes = [8, 32], strides = [1, 1]} : vector<8x128xf32> to vector<8x32xf32>
    %cst_16 = arith.constant 5.000000e-01 : f32
    %30 = vector.broadcast %cst_16 : f32 to vector<8x32xf32>
    %31 = arith.mulf %30, %29 : vector<8x32xf32>
    %32 = math.tanh %31 : vector<8x32xf32>
    %cst_17 = arith.constant 5.000000e-01 : f32
    %33 = vector.broadcast %cst_17 : f32 to vector<8x32xf32>
    %34 = arith.mulf %33, %32 : vector<8x32xf32>
    %cst_18 = arith.constant 5.000000e-01 : f32
    %35 = vector.broadcast %cst_18 : f32 to vector<8x32xf32>
    %36 = arith.addf %34, %35 : vector<8x32xf32>
    %37 = arith.mulf %26, %8 : vector<8x32xf32>
    %38 = arith.mulf %18, %28 : vector<8x32xf32>
    %39 = arith.addf %37, %38 : vector<8x32xf32>
    %40 = math.tanh %39 : vector<8x32xf32>
    %41 = arith.mulf %36, %40 : vector<8x32xf32>
    %42 = vector.extract_strided_slice %10 {offsets = [0, 0], sizes = [8, 32], strides = [1, 1]} : vector<8x128xf32> to vector<8x32xf32>
    %cst_19 = arith.constant 5.000000e-01 : f32
    %43 = vector.broadcast %cst_19 : f32 to vector<8x32xf32>
    %44 = arith.mulf %43, %42 : vector<8x32xf32>
    %45 = math.tanh %44 : vector<8x32xf32>
    %cst_20 = arith.constant 5.000000e-01 : f32
    %46 = vector.broadcast %cst_20 : f32 to vector<8x32xf32>
    %47 = arith.mulf %46, %45 : vector<8x32xf32>
    %cst_21 = arith.constant 5.000000e-01 : f32
    %48 = vector.broadcast %cst_21 : f32 to vector<8x32xf32>
    %49 = arith.addf %47, %48 : vector<8x32xf32>
    %50 = vector.extract_strided_slice %10 {offsets = [0, 32], sizes = [8, 32], strides = [1, 1]} : vector<8x128xf32> to vector<8x32xf32>
    %cst_22 = arith.constant 5.000000e-01 : f32
    %51 = vector.broadcast %cst_22 : f32 to vector<8x32xf32>
    %52 = arith.mulf %51, %50 : vector<8x32xf32>
    %53 = math.tanh %52 : vector<8x32xf32>
    %cst_23 = arith.constant 5.000000e-01 : f32
    %54 = vector.broadcast %cst_23 : f32 to vector<8x32xf32>
    %55 = arith.mulf %54, %53 : vector<8x32xf32>
    %cst_24 = arith.constant 5.000000e-01 : f32
    %56 = vector.broadcast %cst_24 : f32 to vector<8x32xf32>
    %57 = arith.addf %55, %56 : vector<8x32xf32>
    %58 = vector.extract_strided_slice %10 {offsets = [0, 64], sizes = [8, 32], strides = [1, 1]} : vector<8x128xf32> to vector<8x32xf32>
    %59 = math.tanh %58 : vector<8x32xf32>
    %60 = vector.extract_strided_slice %10 {offsets = [0, 96], sizes = [8, 32], strides = [1, 1]} : vector<8x128xf32> to vector<8x32xf32>
    %cst_25 = arith.constant 5.000000e-01 : f32
    %61 = vector.broadcast %cst_25 : f32 to vector<8x32xf32>
    %62 = arith.mulf %61, %60 : vector<8x32xf32>
    %63 = math.tanh %62 : vector<8x32xf32>
    %cst_26 = arith.constant 5.000000e-01 : f32
    %64 = vector.broadcast %cst_26 : f32 to vector<8x32xf32>
    %65 = arith.mulf %64, %63 : vector<8x32xf32>
    %cst_27 = arith.constant 5.000000e-01 : f32
    %66 = vector.broadcast %cst_27 : f32 to vector<8x32xf32>
    %67 = arith.addf %65, %66 : vector<8x32xf32>
    %68 = arith.mulf %57, %8 : vector<8x32xf32>
    %69 = arith.mulf %49, %59 : vector<8x32xf32>
    %70 = arith.addf %68, %69 : vector<8x32xf32>
    %71 = math.tanh %70 : vector<8x32xf32>
    %72 = arith.mulf %67, %71 : vector<8x32xf32>
    %73 = arith.truncf %41 : vector<8x32xf32> to vector<8x32xbf16>
    %cst_28 = arith.constant dense<0.000000e+00> : vector<8x128xf32>
    %74 = tpu.matmul %73, %6, %cst_28 {dimension_numbers = #tpu.dot_dimension_numbers<[1], [0], [0], [1], [0, 0, 1, 1], [], []>} : vector<8x32xbf16>, vector<32x128xbf16>, vector<8x128xf32> -> vector<8x128xf32>
    %75 = arith.truncf %72 : vector<8x32xf32> to vector<8x32xbf16>
    %cst_29 = arith.constant dense<0.000000e+00> : vector<8x128xf32>
    %76 = tpu.matmul %75, %7, %cst_29 {dimension_numbers = #tpu.dot_dimension_numbers<[1], [0], [0], [1], [0, 0, 1, 1], [], []>} : vector<8x32xbf16>, vector<32x128xbf16>, vector<8x128xf32> -> vector<8x128xf32>
    %77 = vector.extract_strided_slice %5 {offsets = [8, 0], sizes = [8, 128], strides = [1, 1]} : vector<64x256xf32> to vector<8x128xf32>
    %78 = arith.addf %74, %77 : vector<8x128xf32>
    %79 = vector.extract_strided_slice %5 {offsets = [48, 128], sizes = [8, 128], strides = [1, 1]} : vector<64x256xf32> to vector<8x128xf32>
    %80 = arith.addf %76, %79 : vector<8x128xf32>
    %81 = vector.extract_strided_slice %78 {offsets = [0, 0], sizes = [8, 32], strides = [1, 1]} : vector<8x128xf32> to vector<8x32xf32>
    %cst_30 = arith.constant 5.000000e-01 : f32
    %82 = vector.broadcast %cst_30 : f32 to vector<8x32xf32>
    %83 = arith.mulf %82, %81 : vector<8x32xf32>
    %84 = math.tanh %83 : vector<8x32xf32>
    %cst_31 = arith.constant 5.000000e-01 : f32
    %85 = vector.broadcast %cst_31 : f32 to vector<8x32xf32>
    %86 = arith.mulf %85, %84 : vector<8x32xf32>
    %cst_32 = arith.constant 5.000000e-01 : f32
    %87 = vector.broadcast %cst_32 : f32 to vector<8x32xf32>
    %88 = arith.addf %86, %87 : vector<8x32xf32>
    %89 = vector.extract_strided_slice %78 {offsets = [0, 32], sizes = [8, 32], strides = [1, 1]} : vector<8x128xf32> to vector<8x32xf32>
    %cst_33 = arith.constant 5.000000e-01 : f32
    %90 = vector.broadcast %cst_33 : f32 to vector<8x32xf32>
    %91 = arith.mulf %90, %89 : vector<8x32xf32>
    %92 = math.tanh %91 : vector<8x32xf32>
    %cst_34 = arith.constant 5.000000e-01 : f32
    %93 = vector.broadcast %cst_34 : f32 to vector<8x32xf32>
    %94 = arith.mulf %93, %92 : vector<8x32xf32>
    %cst_35 = arith.constant 5.000000e-01 : f32
    %95 = vector.broadcast %cst_35 : f32 to vector<8x32xf32>
    %96 = arith.addf %94, %95 : vector<8x32xf32>
    %97 = vector.extract_strided_slice %78 {offsets = [0, 64], sizes = [8, 32], strides = [1, 1]} : vector<8x128xf32> to vector<8x32xf32>
    %98 = math.tanh %97 : vector<8x32xf32>
    %99 = vector.extract_strided_slice %78 {offsets = [0, 96], sizes = [8, 32], strides = [1, 1]} : vector<8x128xf32> to vector<8x32xf32>
    %cst_36 = arith.constant 5.000000e-01 : f32
    %100 = vector.broadcast %cst_36 : f32 to vector<8x32xf32>
    %101 = arith.mulf %100, %99 : vector<8x32xf32>
    %102 = math.tanh %101 : vector<8x32xf32>
    %cst_37 = arith.constant 5.000000e-01 : f32
    %103 = vector.broadcast %cst_37 : f32 to vector<8x32xf32>
    %104 = arith.mulf %103, %102 : vector<8x32xf32>
    %cst_38 = arith.constant 5.000000e-01 : f32
    %105 = vector.broadcast %cst_38 : f32 to vector<8x32xf32>
    %106 = arith.addf %104, %105 : vector<8x32xf32>
    %107 = arith.mulf %96, %39 : vector<8x32xf32>
    %108 = arith.mulf %88, %98 : vector<8x32xf32>
    %109 = arith.addf %107, %108 : vector<8x32xf32>
    %110 = math.tanh %109 : vector<8x32xf32>
    %111 = arith.mulf %106, %110 : vector<8x32xf32>
    %112 = vector.extract_strided_slice %80 {offsets = [0, 0], sizes = [8, 32], strides = [1, 1]} : vector<8x128xf32> to vector<8x32xf32>
    %cst_39 = arith.constant 5.000000e-01 : f32
    %113 = vector.broadcast %cst_39 : f32 to vector<8x32xf32>
    %114 = arith.mulf %113, %112 : vector<8x32xf32>
    %115 = math.tanh %114 : vector<8x32xf32>
    %cst_40 = arith.constant 5.000000e-01 : f32
    %116 = vector.broadcast %cst_40 : f32 to vector<8x32xf32>
    %117 = arith.mulf %116, %115 : vector<8x32xf32>
    %cst_41 = arith.constant 5.000000e-01 : f32
    %118 = vector.broadcast %cst_41 : f32 to vector<8x32xf32>
    %119 = arith.addf %117, %118 : vector<8x32xf32>
    %120 = vector.extract_strided_slice %80 {offsets = [0, 32], sizes = [8, 32], strides = [1, 1]} : vector<8x128xf32> to vector<8x32xf32>
    %cst_42 = arith.constant 5.000000e-01 : f32
    %121 = vector.broadcast %cst_42 : f32 to vector<8x32xf32>
    %122 = arith.mulf %121, %120 : vector<8x32xf32>
    %123 = math.tanh %122 : vector<8x32xf32>
    %cst_43 = arith.constant 5.000000e-01 : f32
    %124 = vector.broadcast %cst_43 : f32 to vector<8x32xf32>
    %125 = arith.mulf %124, %123 : vector<8x32xf32>
    %cst_44 = arith.constant 5.000000e-01 : f32
    %126 = vector.broadcast %cst_44 : f32 to vector<8x32xf32>
    %127 = arith.addf %125, %126 : vector<8x32xf32>
    %128 = vector.extract_strided_slice %80 {offsets = [0, 64], sizes = [8, 32], strides = [1, 1]} : vector<8x128xf32> to vector<8x32xf32>
    %129 = math.tanh %128 : vector<8x32xf32>
    %130 = vector.extract_strided_slice %80 {offsets = [0, 96], sizes = [8, 32], strides = [1, 1]} : vector<8x128xf32> to vector<8x32xf32>
    %cst_45 = arith.constant 5.000000e-01 : f32
    %131 = vector.broadcast %cst_45 : f32 to vector<8x32xf32>
    %132 = arith.mulf %131, %130 : vector<8x32xf32>
    %133 = math.tanh %132 : vector<8x32xf32>
    %cst_46 = arith.constant 5.000000e-01 : f32
    %134 = vector.broadcast %cst_46 : f32 to vector<8x32xf32>
    %135 = arith.mulf %134, %133 : vector<8x32xf32>
    %cst_47 = arith.constant 5.000000e-01 : f32
    %136 = vector.broadcast %cst_47 : f32 to vector<8x32xf32>
    %137 = arith.addf %135, %136 : vector<8x32xf32>
    %138 = arith.mulf %127, %70 : vector<8x32xf32>
    %139 = arith.mulf %119, %129 : vector<8x32xf32>
    %140 = arith.addf %138, %139 : vector<8x32xf32>
    %141 = math.tanh %140 : vector<8x32xf32>
    %142 = arith.mulf %137, %141 : vector<8x32xf32>
    %143 = arith.truncf %111 : vector<8x32xf32> to vector<8x32xbf16>
    %cst_48 = arith.constant dense<0.000000e+00> : vector<8x128xf32>
    %144 = tpu.matmul %143, %6, %cst_48 {dimension_numbers = #tpu.dot_dimension_numbers<[1], [0], [0], [1], [0, 0, 1, 1], [], []>} : vector<8x32xbf16>, vector<32x128xbf16>, vector<8x128xf32> -> vector<8x128xf32>
    %145 = arith.truncf %142 : vector<8x32xf32> to vector<8x32xbf16>
    %cst_49 = arith.constant dense<0.000000e+00> : vector<8x128xf32>
    %146 = tpu.matmul %145, %7, %cst_49 {dimension_numbers = #tpu.dot_dimension_numbers<[1], [0], [0], [1], [0, 0, 1, 1], [], []>} : vector<8x32xbf16>, vector<32x128xbf16>, vector<8x128xf32> -> vector<8x128xf32>
    %147 = vector.extract_strided_slice %5 {offsets = [16, 0], sizes = [8, 128], strides = [1, 1]} : vector<64x256xf32> to vector<8x128xf32>
    %148 = arith.addf %144, %147 : vector<8x128xf32>
    %149 = vector.extract_strided_slice %5 {offsets = [40, 128], sizes = [8, 128], strides = [1, 1]} : vector<64x256xf32> to vector<8x128xf32>
    %150 = arith.addf %146, %149 : vector<8x128xf32>
    %151 = vector.extract_strided_slice %148 {offsets = [0, 0], sizes = [8, 32], strides = [1, 1]} : vector<8x128xf32> to vector<8x32xf32>
    %cst_50 = arith.constant 5.000000e-01 : f32
    %152 = vector.broadcast %cst_50 : f32 to vector<8x32xf32>
    %153 = arith.mulf %152, %151 : vector<8x32xf32>
    %154 = math.tanh %153 : vector<8x32xf32>
    %cst_51 = arith.constant 5.000000e-01 : f32
    %155 = vector.broadcast %cst_51 : f32 to vector<8x32xf32>
    %156 = arith.mulf %155, %154 : vector<8x32xf32>
    %cst_52 = arith.constant 5.000000e-01 : f32
    %157 = vector.broadcast %cst_52 : f32 to vector<8x32xf32>
    %158 = arith.addf %156, %157 : vector<8x32xf32>
    %159 = vector.extract_strided_slice %148 {offsets = [0, 32], sizes = [8, 32], strides = [1, 1]} : vector<8x128xf32> to vector<8x32xf32>
    %cst_53 = arith.constant 5.000000e-01 : f32
    %160 = vector.broadcast %cst_53 : f32 to vector<8x32xf32>
    %161 = arith.mulf %160, %159 : vector<8x32xf32>
    %162 = math.tanh %161 : vector<8x32xf32>
    %cst_54 = arith.constant 5.000000e-01 : f32
    %163 = vector.broadcast %cst_54 : f32 to vector<8x32xf32>
    %164 = arith.mulf %163, %162 : vector<8x32xf32>
    %cst_55 = arith.constant 5.000000e-01 : f32
    %165 = vector.broadcast %cst_55 : f32 to vector<8x32xf32>
    %166 = arith.addf %164, %165 : vector<8x32xf32>
    %167 = vector.extract_strided_slice %148 {offsets = [0, 64], sizes = [8, 32], strides = [1, 1]} : vector<8x128xf32> to vector<8x32xf32>
    %168 = math.tanh %167 : vector<8x32xf32>
    %169 = vector.extract_strided_slice %148 {offsets = [0, 96], sizes = [8, 32], strides = [1, 1]} : vector<8x128xf32> to vector<8x32xf32>
    %cst_56 = arith.constant 5.000000e-01 : f32
    %170 = vector.broadcast %cst_56 : f32 to vector<8x32xf32>
    %171 = arith.mulf %170, %169 : vector<8x32xf32>
    %172 = math.tanh %171 : vector<8x32xf32>
    %cst_57 = arith.constant 5.000000e-01 : f32
    %173 = vector.broadcast %cst_57 : f32 to vector<8x32xf32>
    %174 = arith.mulf %173, %172 : vector<8x32xf32>
    %cst_58 = arith.constant 5.000000e-01 : f32
    %175 = vector.broadcast %cst_58 : f32 to vector<8x32xf32>
    %176 = arith.addf %174, %175 : vector<8x32xf32>
    %177 = arith.mulf %166, %109 : vector<8x32xf32>
    %178 = arith.mulf %158, %168 : vector<8x32xf32>
    %179 = arith.addf %177, %178 : vector<8x32xf32>
    %180 = math.tanh %179 : vector<8x32xf32>
    %181 = arith.mulf %176, %180 : vector<8x32xf32>
    %182 = vector.extract_strided_slice %150 {offsets = [0, 0], sizes = [8, 32], strides = [1, 1]} : vector<8x128xf32> to vector<8x32xf32>
    %cst_59 = arith.constant 5.000000e-01 : f32
    %183 = vector.broadcast %cst_59 : f32 to vector<8x32xf32>
    %184 = arith.mulf %183, %182 : vector<8x32xf32>
    %185 = math.tanh %184 : vector<8x32xf32>
    %cst_60 = arith.constant 5.000000e-01 : f32
    %186 = vector.broadcast %cst_60 : f32 to vector<8x32xf32>
    %187 = arith.mulf %186, %185 : vector<8x32xf32>
    %cst_61 = arith.constant 5.000000e-01 : f32
    %188 = vector.broadcast %cst_61 : f32 to vector<8x32xf32>
    %189 = arith.addf %187, %188 : vector<8x32xf32>
    %190 = vector.extract_strided_slice %150 {offsets = [0, 32], sizes = [8, 32], strides = [1, 1]} : vector<8x128xf32> to vector<8x32xf32>
    %cst_62 = arith.constant 5.000000e-01 : f32
    %191 = vector.broadcast %cst_62 : f32 to vector<8x32xf32>
    %192 = arith.mulf %191, %190 : vector<8x32xf32>
    %193 = math.tanh %192 : vector<8x32xf32>
    %cst_63 = arith.constant 5.000000e-01 : f32
    %194 = vector.broadcast %cst_63 : f32 to vector<8x32xf32>
    %195 = arith.mulf %194, %193 : vector<8x32xf32>
    %cst_64 = arith.constant 5.000000e-01 : f32
    %196 = vector.broadcast %cst_64 : f32 to vector<8x32xf32>
    %197 = arith.addf %195, %196 : vector<8x32xf32>
    %198 = vector.extract_strided_slice %150 {offsets = [0, 64], sizes = [8, 32], strides = [1, 1]} : vector<8x128xf32> to vector<8x32xf32>
    %199 = math.tanh %198 : vector<8x32xf32>
    %200 = vector.extract_strided_slice %150 {offsets = [0, 96], sizes = [8, 32], strides = [1, 1]} : vector<8x128xf32> to vector<8x32xf32>
    %cst_65 = arith.constant 5.000000e-01 : f32
    %201 = vector.broadcast %cst_65 : f32 to vector<8x32xf32>
    %202 = arith.mulf %201, %200 : vector<8x32xf32>
    %203 = math.tanh %202 : vector<8x32xf32>
    %cst_66 = arith.constant 5.000000e-01 : f32
    %204 = vector.broadcast %cst_66 : f32 to vector<8x32xf32>
    %205 = arith.mulf %204, %203 : vector<8x32xf32>
    %cst_67 = arith.constant 5.000000e-01 : f32
    %206 = vector.broadcast %cst_67 : f32 to vector<8x32xf32>
    %207 = arith.addf %205, %206 : vector<8x32xf32>
    %208 = arith.mulf %197, %140 : vector<8x32xf32>
    %209 = arith.mulf %189, %199 : vector<8x32xf32>
    %210 = arith.addf %208, %209 : vector<8x32xf32>
    %211 = math.tanh %210 : vector<8x32xf32>
    %212 = arith.mulf %207, %211 : vector<8x32xf32>
    %213 = arith.truncf %181 : vector<8x32xf32> to vector<8x32xbf16>
    %cst_68 = arith.constant dense<0.000000e+00> : vector<8x128xf32>
    %214 = tpu.matmul %213, %6, %cst_68 {dimension_numbers = #tpu.dot_dimension_numbers<[1], [0], [0], [1], [0, 0, 1, 1], [], []>} : vector<8x32xbf16>, vector<32x128xbf16>, vector<8x128xf32> -> vector<8x128xf32>
    %215 = arith.truncf %212 : vector<8x32xf32> to vector<8x32xbf16>
    %cst_69 = arith.constant dense<0.000000e+00> : vector<8x128xf32>
    %216 = tpu.matmul %215, %7, %cst_69 {dimension_numbers = #tpu.dot_dimension_numbers<[1], [0], [0], [1], [0, 0, 1, 1], [], []>} : vector<8x32xbf16>, vector<32x128xbf16>, vector<8x128xf32> -> vector<8x128xf32>
    %217 = vector.extract_strided_slice %5 {offsets = [24, 0], sizes = [8, 128], strides = [1, 1]} : vector<64x256xf32> to vector<8x128xf32>
    %218 = arith.addf %214, %217 : vector<8x128xf32>
    %219 = vector.extract_strided_slice %5 {offsets = [32, 128], sizes = [8, 128], strides = [1, 1]} : vector<64x256xf32> to vector<8x128xf32>
    %220 = arith.addf %216, %219 : vector<8x128xf32>
    %221 = vector.extract_strided_slice %218 {offsets = [0, 0], sizes = [8, 32], strides = [1, 1]} : vector<8x128xf32> to vector<8x32xf32>
    %cst_70 = arith.constant 5.000000e-01 : f32
    %222 = vector.broadcast %cst_70 : f32 to vector<8x32xf32>
    %223 = arith.mulf %222, %221 : vector<8x32xf32>
    %224 = math.tanh %223 : vector<8x32xf32>
    %cst_71 = arith.constant 5.000000e-01 : f32
    %225 = vector.broadcast %cst_71 : f32 to vector<8x32xf32>
    %226 = arith.mulf %225, %224 : vector<8x32xf32>
    %cst_72 = arith.constant 5.000000e-01 : f32
    %227 = vector.broadcast %cst_72 : f32 to vector<8x32xf32>
    %228 = arith.addf %226, %227 : vector<8x32xf32>
    %229 = vector.extract_strided_slice %218 {offsets = [0, 32], sizes = [8, 32], strides = [1, 1]} : vector<8x128xf32> to vector<8x32xf32>
    %cst_73 = arith.constant 5.000000e-01 : f32
    %230 = vector.broadcast %cst_73 : f32 to vector<8x32xf32>
    %231 = arith.mulf %230, %229 : vector<8x32xf32>
    %232 = math.tanh %231 : vector<8x32xf32>
    %cst_74 = arith.constant 5.000000e-01 : f32
    %233 = vector.broadcast %cst_74 : f32 to vector<8x32xf32>
    %234 = arith.mulf %233, %232 : vector<8x32xf32>
    %cst_75 = arith.constant 5.000000e-01 : f32
    %235 = vector.broadcast %cst_75 : f32 to vector<8x32xf32>
    %236 = arith.addf %234, %235 : vector<8x32xf32>
    %237 = vector.extract_strided_slice %218 {offsets = [0, 64], sizes = [8, 32], strides = [1, 1]} : vector<8x128xf32> to vector<8x32xf32>
    %238 = math.tanh %237 : vector<8x32xf32>
    %239 = vector.extract_strided_slice %218 {offsets = [0, 96], sizes = [8, 32], strides = [1, 1]} : vector<8x128xf32> to vector<8x32xf32>
    %cst_76 = arith.constant 5.000000e-01 : f32
    %240 = vector.broadcast %cst_76 : f32 to vector<8x32xf32>
    %241 = arith.mulf %240, %239 : vector<8x32xf32>
    %242 = math.tanh %241 : vector<8x32xf32>
    %cst_77 = arith.constant 5.000000e-01 : f32
    %243 = vector.broadcast %cst_77 : f32 to vector<8x32xf32>
    %244 = arith.mulf %243, %242 : vector<8x32xf32>
    %cst_78 = arith.constant 5.000000e-01 : f32
    %245 = vector.broadcast %cst_78 : f32 to vector<8x32xf32>
    %246 = arith.addf %244, %245 : vector<8x32xf32>
    %247 = arith.mulf %236, %179 : vector<8x32xf32>
    %248 = arith.mulf %228, %238 : vector<8x32xf32>
    %249 = arith.addf %247, %248 : vector<8x32xf32>
    %250 = math.tanh %249 : vector<8x32xf32>
    %251 = arith.mulf %246, %250 : vector<8x32xf32>
    %252 = vector.extract_strided_slice %220 {offsets = [0, 0], sizes = [8, 32], strides = [1, 1]} : vector<8x128xf32> to vector<8x32xf32>
    %cst_79 = arith.constant 5.000000e-01 : f32
    %253 = vector.broadcast %cst_79 : f32 to vector<8x32xf32>
    %254 = arith.mulf %253, %252 : vector<8x32xf32>
    %255 = math.tanh %254 : vector<8x32xf32>
    %cst_80 = arith.constant 5.000000e-01 : f32
    %256 = vector.broadcast %cst_80 : f32 to vector<8x32xf32>
    %257 = arith.mulf %256, %255 : vector<8x32xf32>
    %cst_81 = arith.constant 5.000000e-01 : f32
    %258 = vector.broadcast %cst_81 : f32 to vector<8x32xf32>
    %259 = arith.addf %257, %258 : vector<8x32xf32>
    %260 = vector.extract_strided_slice %220 {offsets = [0, 32], sizes = [8, 32], strides = [1, 1]} : vector<8x128xf32> to vector<8x32xf32>
    %cst_82 = arith.constant 5.000000e-01 : f32
    %261 = vector.broadcast %cst_82 : f32 to vector<8x32xf32>
    %262 = arith.mulf %261, %260 : vector<8x32xf32>
    %263 = math.tanh %262 : vector<8x32xf32>
    %cst_83 = arith.constant 5.000000e-01 : f32
    %264 = vector.broadcast %cst_83 : f32 to vector<8x32xf32>
    %265 = arith.mulf %264, %263 : vector<8x32xf32>
    %cst_84 = arith.constant 5.000000e-01 : f32
    %266 = vector.broadcast %cst_84 : f32 to vector<8x32xf32>
    %267 = arith.addf %265, %266 : vector<8x32xf32>
    %268 = vector.extract_strided_slice %220 {offsets = [0, 64], sizes = [8, 32], strides = [1, 1]} : vector<8x128xf32> to vector<8x32xf32>
    %269 = math.tanh %268 : vector<8x32xf32>
    %270 = vector.extract_strided_slice %220 {offsets = [0, 96], sizes = [8, 32], strides = [1, 1]} : vector<8x128xf32> to vector<8x32xf32>
    %cst_85 = arith.constant 5.000000e-01 : f32
    %271 = vector.broadcast %cst_85 : f32 to vector<8x32xf32>
    %272 = arith.mulf %271, %270 : vector<8x32xf32>
    %273 = math.tanh %272 : vector<8x32xf32>
    %cst_86 = arith.constant 5.000000e-01 : f32
    %274 = vector.broadcast %cst_86 : f32 to vector<8x32xf32>
    %275 = arith.mulf %274, %273 : vector<8x32xf32>
    %cst_87 = arith.constant 5.000000e-01 : f32
    %276 = vector.broadcast %cst_87 : f32 to vector<8x32xf32>
    %277 = arith.addf %275, %276 : vector<8x32xf32>
    %278 = arith.mulf %267, %210 : vector<8x32xf32>
    %279 = arith.mulf %259, %269 : vector<8x32xf32>
    %280 = arith.addf %278, %279 : vector<8x32xf32>
    %281 = math.tanh %280 : vector<8x32xf32>
    %282 = arith.mulf %277, %281 : vector<8x32xf32>
    %283 = arith.truncf %251 : vector<8x32xf32> to vector<8x32xbf16>
    %cst_88 = arith.constant dense<0.000000e+00> : vector<8x128xf32>
    %284 = tpu.matmul %283, %6, %cst_88 {dimension_numbers = #tpu.dot_dimension_numbers<[1], [0], [0], [1], [0, 0, 1, 1], [], []>} : vector<8x32xbf16>, vector<32x128xbf16>, vector<8x128xf32> -> vector<8x128xf32>
    %285 = arith.truncf %282 : vector<8x32xf32> to vector<8x32xbf16>
    %cst_89 = arith.constant dense<0.000000e+00> : vector<8x128xf32>
    %286 = tpu.matmul %285, %7, %cst_89 {dimension_numbers = #tpu.dot_dimension_numbers<[1], [0], [0], [1], [0, 0, 1, 1], [], []>} : vector<8x32xbf16>, vector<32x128xbf16>, vector<8x128xf32> -> vector<8x128xf32>
    %287 = vector.extract_strided_slice %5 {offsets = [32, 0], sizes = [8, 128], strides = [1, 1]} : vector<64x256xf32> to vector<8x128xf32>
    %288 = arith.addf %284, %287 : vector<8x128xf32>
    %289 = vector.extract_strided_slice %5 {offsets = [24, 128], sizes = [8, 128], strides = [1, 1]} : vector<64x256xf32> to vector<8x128xf32>
    %290 = arith.addf %286, %289 : vector<8x128xf32>
    %291 = vector.extract_strided_slice %288 {offsets = [0, 0], sizes = [8, 32], strides = [1, 1]} : vector<8x128xf32> to vector<8x32xf32>
    %cst_90 = arith.constant 5.000000e-01 : f32
    %292 = vector.broadcast %cst_90 : f32 to vector<8x32xf32>
    %293 = arith.mulf %292, %291 : vector<8x32xf32>
    %294 = math.tanh %293 : vector<8x32xf32>
    %cst_91 = arith.constant 5.000000e-01 : f32
    %295 = vector.broadcast %cst_91 : f32 to vector<8x32xf32>
    %296 = arith.mulf %295, %294 : vector<8x32xf32>
    %cst_92 = arith.constant 5.000000e-01 : f32
    %297 = vector.broadcast %cst_92 : f32 to vector<8x32xf32>
    %298 = arith.addf %296, %297 : vector<8x32xf32>
    %299 = vector.extract_strided_slice %288 {offsets = [0, 32], sizes = [8, 32], strides = [1, 1]} : vector<8x128xf32> to vector<8x32xf32>
    %cst_93 = arith.constant 5.000000e-01 : f32
    %300 = vector.broadcast %cst_93 : f32 to vector<8x32xf32>
    %301 = arith.mulf %300, %299 : vector<8x32xf32>
    %302 = math.tanh %301 : vector<8x32xf32>
    %cst_94 = arith.constant 5.000000e-01 : f32
    %303 = vector.broadcast %cst_94 : f32 to vector<8x32xf32>
    %304 = arith.mulf %303, %302 : vector<8x32xf32>
    %cst_95 = arith.constant 5.000000e-01 : f32
    %305 = vector.broadcast %cst_95 : f32 to vector<8x32xf32>
    %306 = arith.addf %304, %305 : vector<8x32xf32>
    %307 = vector.extract_strided_slice %288 {offsets = [0, 64], sizes = [8, 32], strides = [1, 1]} : vector<8x128xf32> to vector<8x32xf32>
    %308 = math.tanh %307 : vector<8x32xf32>
    %309 = vector.extract_strided_slice %288 {offsets = [0, 96], sizes = [8, 32], strides = [1, 1]} : vector<8x128xf32> to vector<8x32xf32>
    %cst_96 = arith.constant 5.000000e-01 : f32
    %310 = vector.broadcast %cst_96 : f32 to vector<8x32xf32>
    %311 = arith.mulf %310, %309 : vector<8x32xf32>
    %312 = math.tanh %311 : vector<8x32xf32>
    %cst_97 = arith.constant 5.000000e-01 : f32
    %313 = vector.broadcast %cst_97 : f32 to vector<8x32xf32>
    %314 = arith.mulf %313, %312 : vector<8x32xf32>
    %cst_98 = arith.constant 5.000000e-01 : f32
    %315 = vector.broadcast %cst_98 : f32 to vector<8x32xf32>
    %316 = arith.addf %314, %315 : vector<8x32xf32>
    %317 = arith.mulf %306, %249 : vector<8x32xf32>
    %318 = arith.mulf %298, %308 : vector<8x32xf32>
    %319 = arith.addf %317, %318 : vector<8x32xf32>
    %320 = math.tanh %319 : vector<8x32xf32>
    %321 = arith.mulf %316, %320 : vector<8x32xf32>
    %322 = vector.extract_strided_slice %290 {offsets = [0, 0], sizes = [8, 32], strides = [1, 1]} : vector<8x128xf32> to vector<8x32xf32>
    %cst_99 = arith.constant 5.000000e-01 : f32
    %323 = vector.broadcast %cst_99 : f32 to vector<8x32xf32>
    %324 = arith.mulf %323, %322 : vector<8x32xf32>
    %325 = math.tanh %324 : vector<8x32xf32>
    %cst_100 = arith.constant 5.000000e-01 : f32
    %326 = vector.broadcast %cst_100 : f32 to vector<8x32xf32>
    %327 = arith.mulf %326, %325 : vector<8x32xf32>
    %cst_101 = arith.constant 5.000000e-01 : f32
    %328 = vector.broadcast %cst_101 : f32 to vector<8x32xf32>
    %329 = arith.addf %327, %328 : vector<8x32xf32>
    %330 = vector.extract_strided_slice %290 {offsets = [0, 32], sizes = [8, 32], strides = [1, 1]} : vector<8x128xf32> to vector<8x32xf32>
    %cst_102 = arith.constant 5.000000e-01 : f32
    %331 = vector.broadcast %cst_102 : f32 to vector<8x32xf32>
    %332 = arith.mulf %331, %330 : vector<8x32xf32>
    %333 = math.tanh %332 : vector<8x32xf32>
    %cst_103 = arith.constant 5.000000e-01 : f32
    %334 = vector.broadcast %cst_103 : f32 to vector<8x32xf32>
    %335 = arith.mulf %334, %333 : vector<8x32xf32>
    %cst_104 = arith.constant 5.000000e-01 : f32
    %336 = vector.broadcast %cst_104 : f32 to vector<8x32xf32>
    %337 = arith.addf %335, %336 : vector<8x32xf32>
    %338 = vector.extract_strided_slice %290 {offsets = [0, 64], sizes = [8, 32], strides = [1, 1]} : vector<8x128xf32> to vector<8x32xf32>
    %339 = math.tanh %338 : vector<8x32xf32>
    %340 = vector.extract_strided_slice %290 {offsets = [0, 96], sizes = [8, 32], strides = [1, 1]} : vector<8x128xf32> to vector<8x32xf32>
    %cst_105 = arith.constant 5.000000e-01 : f32
    %341 = vector.broadcast %cst_105 : f32 to vector<8x32xf32>
    %342 = arith.mulf %341, %340 : vector<8x32xf32>
    %343 = math.tanh %342 : vector<8x32xf32>
    %cst_106 = arith.constant 5.000000e-01 : f32
    %344 = vector.broadcast %cst_106 : f32 to vector<8x32xf32>
    %345 = arith.mulf %344, %343 : vector<8x32xf32>
    %cst_107 = arith.constant 5.000000e-01 : f32
    %346 = vector.broadcast %cst_107 : f32 to vector<8x32xf32>
    %347 = arith.addf %345, %346 : vector<8x32xf32>
    %348 = arith.mulf %337, %280 : vector<8x32xf32>
    %349 = arith.mulf %329, %339 : vector<8x32xf32>
    %350 = arith.addf %348, %349 : vector<8x32xf32>
    %351 = math.tanh %350 : vector<8x32xf32>
    %352 = arith.mulf %347, %351 : vector<8x32xf32>
    %353 = arith.truncf %321 : vector<8x32xf32> to vector<8x32xbf16>
    %cst_108 = arith.constant dense<0.000000e+00> : vector<8x128xf32>
    %354 = tpu.matmul %353, %6, %cst_108 {dimension_numbers = #tpu.dot_dimension_numbers<[1], [0], [0], [1], [0, 0, 1, 1], [], []>} : vector<8x32xbf16>, vector<32x128xbf16>, vector<8x128xf32> -> vector<8x128xf32>
    %355 = arith.truncf %352 : vector<8x32xf32> to vector<8x32xbf16>
    %cst_109 = arith.constant dense<0.000000e+00> : vector<8x128xf32>
    %356 = tpu.matmul %355, %7, %cst_109 {dimension_numbers = #tpu.dot_dimension_numbers<[1], [0], [0], [1], [0, 0, 1, 1], [], []>} : vector<8x32xbf16>, vector<32x128xbf16>, vector<8x128xf32> -> vector<8x128xf32>
    %357 = vector.extract_strided_slice %5 {offsets = [40, 0], sizes = [8, 128], strides = [1, 1]} : vector<64x256xf32> to vector<8x128xf32>
    %358 = arith.addf %354, %357 : vector<8x128xf32>
    %359 = vector.extract_strided_slice %5 {offsets = [16, 128], sizes = [8, 128], strides = [1, 1]} : vector<64x256xf32> to vector<8x128xf32>
    %360 = arith.addf %356, %359 : vector<8x128xf32>
    %361 = vector.extract_strided_slice %358 {offsets = [0, 0], sizes = [8, 32], strides = [1, 1]} : vector<8x128xf32> to vector<8x32xf32>
    %cst_110 = arith.constant 5.000000e-01 : f32
    %362 = vector.broadcast %cst_110 : f32 to vector<8x32xf32>
    %363 = arith.mulf %362, %361 : vector<8x32xf32>
    %364 = math.tanh %363 : vector<8x32xf32>
    %cst_111 = arith.constant 5.000000e-01 : f32
    %365 = vector.broadcast %cst_111 : f32 to vector<8x32xf32>
    %366 = arith.mulf %365, %364 : vector<8x32xf32>
    %cst_112 = arith.constant 5.000000e-01 : f32
    %367 = vector.broadcast %cst_112 : f32 to vector<8x32xf32>
    %368 = arith.addf %366, %367 : vector<8x32xf32>
    %369 = vector.extract_strided_slice %358 {offsets = [0, 32], sizes = [8, 32], strides = [1, 1]} : vector<8x128xf32> to vector<8x32xf32>
    %cst_113 = arith.constant 5.000000e-01 : f32
    %370 = vector.broadcast %cst_113 : f32 to vector<8x32xf32>
    %371 = arith.mulf %370, %369 : vector<8x32xf32>
    %372 = math.tanh %371 : vector<8x32xf32>
    %cst_114 = arith.constant 5.000000e-01 : f32
    %373 = vector.broadcast %cst_114 : f32 to vector<8x32xf32>
    %374 = arith.mulf %373, %372 : vector<8x32xf32>
    %cst_115 = arith.constant 5.000000e-01 : f32
    %375 = vector.broadcast %cst_115 : f32 to vector<8x32xf32>
    %376 = arith.addf %374, %375 : vector<8x32xf32>
    %377 = vector.extract_strided_slice %358 {offsets = [0, 64], sizes = [8, 32], strides = [1, 1]} : vector<8x128xf32> to vector<8x32xf32>
    %378 = math.tanh %377 : vector<8x32xf32>
    %379 = vector.extract_strided_slice %358 {offsets = [0, 96], sizes = [8, 32], strides = [1, 1]} : vector<8x128xf32> to vector<8x32xf32>
    %cst_116 = arith.constant 5.000000e-01 : f32
    %380 = vector.broadcast %cst_116 : f32 to vector<8x32xf32>
    %381 = arith.mulf %380, %379 : vector<8x32xf32>
    %382 = math.tanh %381 : vector<8x32xf32>
    %cst_117 = arith.constant 5.000000e-01 : f32
    %383 = vector.broadcast %cst_117 : f32 to vector<8x32xf32>
    %384 = arith.mulf %383, %382 : vector<8x32xf32>
    %cst_118 = arith.constant 5.000000e-01 : f32
    %385 = vector.broadcast %cst_118 : f32 to vector<8x32xf32>
    %386 = arith.addf %384, %385 : vector<8x32xf32>
    %387 = arith.mulf %376, %319 : vector<8x32xf32>
    %388 = arith.mulf %368, %378 : vector<8x32xf32>
    %389 = arith.addf %387, %388 : vector<8x32xf32>
    %390 = math.tanh %389 : vector<8x32xf32>
    %391 = arith.mulf %386, %390 : vector<8x32xf32>
    %392 = vector.extract_strided_slice %360 {offsets = [0, 0], sizes = [8, 32], strides = [1, 1]} : vector<8x128xf32> to vector<8x32xf32>
    %cst_119 = arith.constant 5.000000e-01 : f32
    %393 = vector.broadcast %cst_119 : f32 to vector<8x32xf32>
    %394 = arith.mulf %393, %392 : vector<8x32xf32>
    %395 = math.tanh %394 : vector<8x32xf32>
    %cst_120 = arith.constant 5.000000e-01 : f32
    %396 = vector.broadcast %cst_120 : f32 to vector<8x32xf32>
    %397 = arith.mulf %396, %395 : vector<8x32xf32>
    %cst_121 = arith.constant 5.000000e-01 : f32
    %398 = vector.broadcast %cst_121 : f32 to vector<8x32xf32>
    %399 = arith.addf %397, %398 : vector<8x32xf32>
    %400 = vector.extract_strided_slice %360 {offsets = [0, 32], sizes = [8, 32], strides = [1, 1]} : vector<8x128xf32> to vector<8x32xf32>
    %cst_122 = arith.constant 5.000000e-01 : f32
    %401 = vector.broadcast %cst_122 : f32 to vector<8x32xf32>
    %402 = arith.mulf %401, %400 : vector<8x32xf32>
    %403 = math.tanh %402 : vector<8x32xf32>
    %cst_123 = arith.constant 5.000000e-01 : f32
    %404 = vector.broadcast %cst_123 : f32 to vector<8x32xf32>
    %405 = arith.mulf %404, %403 : vector<8x32xf32>
    %cst_124 = arith.constant 5.000000e-01 : f32
    %406 = vector.broadcast %cst_124 : f32 to vector<8x32xf32>
    %407 = arith.addf %405, %406 : vector<8x32xf32>
    %408 = vector.extract_strided_slice %360 {offsets = [0, 64], sizes = [8, 32], strides = [1, 1]} : vector<8x128xf32> to vector<8x32xf32>
    %409 = math.tanh %408 : vector<8x32xf32>
    %410 = vector.extract_strided_slice %360 {offsets = [0, 96], sizes = [8, 32], strides = [1, 1]} : vector<8x128xf32> to vector<8x32xf32>
    %cst_125 = arith.constant 5.000000e-01 : f32
    %411 = vector.broadcast %cst_125 : f32 to vector<8x32xf32>
    %412 = arith.mulf %411, %410 : vector<8x32xf32>
    %413 = math.tanh %412 : vector<8x32xf32>
    %cst_126 = arith.constant 5.000000e-01 : f32
    %414 = vector.broadcast %cst_126 : f32 to vector<8x32xf32>
    %415 = arith.mulf %414, %413 : vector<8x32xf32>
    %cst_127 = arith.constant 5.000000e-01 : f32
    %416 = vector.broadcast %cst_127 : f32 to vector<8x32xf32>
    %417 = arith.addf %415, %416 : vector<8x32xf32>
    %418 = arith.mulf %407, %350 : vector<8x32xf32>
    %419 = arith.mulf %399, %409 : vector<8x32xf32>
    %420 = arith.addf %418, %419 : vector<8x32xf32>
    %421 = math.tanh %420 : vector<8x32xf32>
    %422 = arith.mulf %417, %421 : vector<8x32xf32>
    %423 = arith.truncf %391 : vector<8x32xf32> to vector<8x32xbf16>
    %cst_128 = arith.constant dense<0.000000e+00> : vector<8x128xf32>
    %424 = tpu.matmul %423, %6, %cst_128 {dimension_numbers = #tpu.dot_dimension_numbers<[1], [0], [0], [1], [0, 0, 1, 1], [], []>} : vector<8x32xbf16>, vector<32x128xbf16>, vector<8x128xf32> -> vector<8x128xf32>
    %425 = arith.truncf %422 : vector<8x32xf32> to vector<8x32xbf16>
    %cst_129 = arith.constant dense<0.000000e+00> : vector<8x128xf32>
    %426 = tpu.matmul %425, %7, %cst_129 {dimension_numbers = #tpu.dot_dimension_numbers<[1], [0], [0], [1], [0, 0, 1, 1], [], []>} : vector<8x32xbf16>, vector<32x128xbf16>, vector<8x128xf32> -> vector<8x128xf32>
    %427 = vector.extract_strided_slice %5 {offsets = [48, 0], sizes = [8, 128], strides = [1, 1]} : vector<64x256xf32> to vector<8x128xf32>
    %428 = arith.addf %424, %427 : vector<8x128xf32>
    %429 = vector.extract_strided_slice %5 {offsets = [8, 128], sizes = [8, 128], strides = [1, 1]} : vector<64x256xf32> to vector<8x128xf32>
    %430 = arith.addf %426, %429 : vector<8x128xf32>
    %431 = vector.extract_strided_slice %428 {offsets = [0, 0], sizes = [8, 32], strides = [1, 1]} : vector<8x128xf32> to vector<8x32xf32>
    %cst_130 = arith.constant 5.000000e-01 : f32
    %432 = vector.broadcast %cst_130 : f32 to vector<8x32xf32>
    %433 = arith.mulf %432, %431 : vector<8x32xf32>
    %434 = math.tanh %433 : vector<8x32xf32>
    %cst_131 = arith.constant 5.000000e-01 : f32
    %435 = vector.broadcast %cst_131 : f32 to vector<8x32xf32>
    %436 = arith.mulf %435, %434 : vector<8x32xf32>
    %cst_132 = arith.constant 5.000000e-01 : f32
    %437 = vector.broadcast %cst_132 : f32 to vector<8x32xf32>
    %438 = arith.addf %436, %437 : vector<8x32xf32>
    %439 = vector.extract_strided_slice %428 {offsets = [0, 32], sizes = [8, 32], strides = [1, 1]} : vector<8x128xf32> to vector<8x32xf32>
    %cst_133 = arith.constant 5.000000e-01 : f32
    %440 = vector.broadcast %cst_133 : f32 to vector<8x32xf32>
    %441 = arith.mulf %440, %439 : vector<8x32xf32>
    %442 = math.tanh %441 : vector<8x32xf32>
    %cst_134 = arith.constant 5.000000e-01 : f32
    %443 = vector.broadcast %cst_134 : f32 to vector<8x32xf32>
    %444 = arith.mulf %443, %442 : vector<8x32xf32>
    %cst_135 = arith.constant 5.000000e-01 : f32
    %445 = vector.broadcast %cst_135 : f32 to vector<8x32xf32>
    %446 = arith.addf %444, %445 : vector<8x32xf32>
    %447 = vector.extract_strided_slice %428 {offsets = [0, 64], sizes = [8, 32], strides = [1, 1]} : vector<8x128xf32> to vector<8x32xf32>
    %448 = math.tanh %447 : vector<8x32xf32>
    %449 = vector.extract_strided_slice %428 {offsets = [0, 96], sizes = [8, 32], strides = [1, 1]} : vector<8x128xf32> to vector<8x32xf32>
    %cst_136 = arith.constant 5.000000e-01 : f32
    %450 = vector.broadcast %cst_136 : f32 to vector<8x32xf32>
    %451 = arith.mulf %450, %449 : vector<8x32xf32>
    %452 = math.tanh %451 : vector<8x32xf32>
    %cst_137 = arith.constant 5.000000e-01 : f32
    %453 = vector.broadcast %cst_137 : f32 to vector<8x32xf32>
    %454 = arith.mulf %453, %452 : vector<8x32xf32>
    %cst_138 = arith.constant 5.000000e-01 : f32
    %455 = vector.broadcast %cst_138 : f32 to vector<8x32xf32>
    %456 = arith.addf %454, %455 : vector<8x32xf32>
    %457 = arith.mulf %446, %389 : vector<8x32xf32>
    %458 = arith.mulf %438, %448 : vector<8x32xf32>
    %459 = arith.addf %457, %458 : vector<8x32xf32>
    %460 = math.tanh %459 : vector<8x32xf32>
    %461 = arith.mulf %456, %460 : vector<8x32xf32>
    %462 = vector.extract_strided_slice %430 {offsets = [0, 0], sizes = [8, 32], strides = [1, 1]} : vector<8x128xf32> to vector<8x32xf32>
    %cst_139 = arith.constant 5.000000e-01 : f32
    %463 = vector.broadcast %cst_139 : f32 to vector<8x32xf32>
    %464 = arith.mulf %463, %462 : vector<8x32xf32>
    %465 = math.tanh %464 : vector<8x32xf32>
    %cst_140 = arith.constant 5.000000e-01 : f32
    %466 = vector.broadcast %cst_140 : f32 to vector<8x32xf32>
    %467 = arith.mulf %466, %465 : vector<8x32xf32>
    %cst_141 = arith.constant 5.000000e-01 : f32
    %468 = vector.broadcast %cst_141 : f32 to vector<8x32xf32>
    %469 = arith.addf %467, %468 : vector<8x32xf32>
    %470 = vector.extract_strided_slice %430 {offsets = [0, 32], sizes = [8, 32], strides = [1, 1]} : vector<8x128xf32> to vector<8x32xf32>
    %cst_142 = arith.constant 5.000000e-01 : f32
    %471 = vector.broadcast %cst_142 : f32 to vector<8x32xf32>
    %472 = arith.mulf %471, %470 : vector<8x32xf32>
    %473 = math.tanh %472 : vector<8x32xf32>
    %cst_143 = arith.constant 5.000000e-01 : f32
    %474 = vector.broadcast %cst_143 : f32 to vector<8x32xf32>
    %475 = arith.mulf %474, %473 : vector<8x32xf32>
    %cst_144 = arith.constant 5.000000e-01 : f32
    %476 = vector.broadcast %cst_144 : f32 to vector<8x32xf32>
    %477 = arith.addf %475, %476 : vector<8x32xf32>
    %478 = vector.extract_strided_slice %430 {offsets = [0, 64], sizes = [8, 32], strides = [1, 1]} : vector<8x128xf32> to vector<8x32xf32>
    %479 = math.tanh %478 : vector<8x32xf32>
    %480 = vector.extract_strided_slice %430 {offsets = [0, 96], sizes = [8, 32], strides = [1, 1]} : vector<8x128xf32> to vector<8x32xf32>
    %cst_145 = arith.constant 5.000000e-01 : f32
    %481 = vector.broadcast %cst_145 : f32 to vector<8x32xf32>
    %482 = arith.mulf %481, %480 : vector<8x32xf32>
    %483 = math.tanh %482 : vector<8x32xf32>
    %cst_146 = arith.constant 5.000000e-01 : f32
    %484 = vector.broadcast %cst_146 : f32 to vector<8x32xf32>
    %485 = arith.mulf %484, %483 : vector<8x32xf32>
    %cst_147 = arith.constant 5.000000e-01 : f32
    %486 = vector.broadcast %cst_147 : f32 to vector<8x32xf32>
    %487 = arith.addf %485, %486 : vector<8x32xf32>
    %488 = arith.mulf %477, %420 : vector<8x32xf32>
    %489 = arith.mulf %469, %479 : vector<8x32xf32>
    %490 = arith.addf %488, %489 : vector<8x32xf32>
    %491 = math.tanh %490 : vector<8x32xf32>
    %492 = arith.mulf %487, %491 : vector<8x32xf32>
    %493 = arith.truncf %461 : vector<8x32xf32> to vector<8x32xbf16>
    %cst_148 = arith.constant dense<0.000000e+00> : vector<8x128xf32>
    %494 = tpu.matmul %493, %6, %cst_148 {dimension_numbers = #tpu.dot_dimension_numbers<[1], [0], [0], [1], [0, 0, 1, 1], [], []>} : vector<8x32xbf16>, vector<32x128xbf16>, vector<8x128xf32> -> vector<8x128xf32>
    %495 = arith.truncf %492 : vector<8x32xf32> to vector<8x32xbf16>
    %cst_149 = arith.constant dense<0.000000e+00> : vector<8x128xf32>
    %496 = tpu.matmul %495, %7, %cst_149 {dimension_numbers = #tpu.dot_dimension_numbers<[1], [0], [0], [1], [0, 0, 1, 1], [], []>} : vector<8x32xbf16>, vector<32x128xbf16>, vector<8x128xf32> -> vector<8x128xf32>
    %497 = vector.extract_strided_slice %5 {offsets = [56, 0], sizes = [8, 128], strides = [1, 1]} : vector<64x256xf32> to vector<8x128xf32>
    %498 = arith.addf %494, %497 : vector<8x128xf32>
    %499 = vector.extract_strided_slice %5 {offsets = [0, 128], sizes = [8, 128], strides = [1, 1]} : vector<64x256xf32> to vector<8x128xf32>
    %500 = arith.addf %496, %499 : vector<8x128xf32>
    %501 = vector.extract_strided_slice %498 {offsets = [0, 0], sizes = [8, 32], strides = [1, 1]} : vector<8x128xf32> to vector<8x32xf32>
    %cst_150 = arith.constant 5.000000e-01 : f32
    %502 = vector.broadcast %cst_150 : f32 to vector<8x32xf32>
    %503 = arith.mulf %502, %501 : vector<8x32xf32>
    %504 = math.tanh %503 : vector<8x32xf32>
    %cst_151 = arith.constant 5.000000e-01 : f32
    %505 = vector.broadcast %cst_151 : f32 to vector<8x32xf32>
    %506 = arith.mulf %505, %504 : vector<8x32xf32>
    %cst_152 = arith.constant 5.000000e-01 : f32
    %507 = vector.broadcast %cst_152 : f32 to vector<8x32xf32>
    %508 = arith.addf %506, %507 : vector<8x32xf32>
    %509 = vector.extract_strided_slice %498 {offsets = [0, 32], sizes = [8, 32], strides = [1, 1]} : vector<8x128xf32> to vector<8x32xf32>
    %cst_153 = arith.constant 5.000000e-01 : f32
    %510 = vector.broadcast %cst_153 : f32 to vector<8x32xf32>
    %511 = arith.mulf %510, %509 : vector<8x32xf32>
    %512 = math.tanh %511 : vector<8x32xf32>
    %cst_154 = arith.constant 5.000000e-01 : f32
    %513 = vector.broadcast %cst_154 : f32 to vector<8x32xf32>
    %514 = arith.mulf %513, %512 : vector<8x32xf32>
    %cst_155 = arith.constant 5.000000e-01 : f32
    %515 = vector.broadcast %cst_155 : f32 to vector<8x32xf32>
    %516 = arith.addf %514, %515 : vector<8x32xf32>
    %517 = vector.extract_strided_slice %498 {offsets = [0, 64], sizes = [8, 32], strides = [1, 1]} : vector<8x128xf32> to vector<8x32xf32>
    %518 = math.tanh %517 : vector<8x32xf32>
    %519 = vector.extract_strided_slice %498 {offsets = [0, 96], sizes = [8, 32], strides = [1, 1]} : vector<8x128xf32> to vector<8x32xf32>
    %cst_156 = arith.constant 5.000000e-01 : f32
    %520 = vector.broadcast %cst_156 : f32 to vector<8x32xf32>
    %521 = arith.mulf %520, %519 : vector<8x32xf32>
    %522 = math.tanh %521 : vector<8x32xf32>
    %cst_157 = arith.constant 5.000000e-01 : f32
    %523 = vector.broadcast %cst_157 : f32 to vector<8x32xf32>
    %524 = arith.mulf %523, %522 : vector<8x32xf32>
    %cst_158 = arith.constant 5.000000e-01 : f32
    %525 = vector.broadcast %cst_158 : f32 to vector<8x32xf32>
    %526 = arith.addf %524, %525 : vector<8x32xf32>
    %527 = arith.mulf %516, %459 : vector<8x32xf32>
    %528 = arith.mulf %508, %518 : vector<8x32xf32>
    %529 = arith.addf %527, %528 : vector<8x32xf32>
    %530 = math.tanh %529 : vector<8x32xf32>
    %531 = arith.mulf %526, %530 : vector<8x32xf32>
    %532 = vector.extract_strided_slice %500 {offsets = [0, 0], sizes = [8, 32], strides = [1, 1]} : vector<8x128xf32> to vector<8x32xf32>
    %cst_159 = arith.constant 5.000000e-01 : f32
    %533 = vector.broadcast %cst_159 : f32 to vector<8x32xf32>
    %534 = arith.mulf %533, %532 : vector<8x32xf32>
    %535 = math.tanh %534 : vector<8x32xf32>
    %cst_160 = arith.constant 5.000000e-01 : f32
    %536 = vector.broadcast %cst_160 : f32 to vector<8x32xf32>
    %537 = arith.mulf %536, %535 : vector<8x32xf32>
    %cst_161 = arith.constant 5.000000e-01 : f32
    %538 = vector.broadcast %cst_161 : f32 to vector<8x32xf32>
    %539 = arith.addf %537, %538 : vector<8x32xf32>
    %540 = vector.extract_strided_slice %500 {offsets = [0, 32], sizes = [8, 32], strides = [1, 1]} : vector<8x128xf32> to vector<8x32xf32>
    %cst_162 = arith.constant 5.000000e-01 : f32
    %541 = vector.broadcast %cst_162 : f32 to vector<8x32xf32>
    %542 = arith.mulf %541, %540 : vector<8x32xf32>
    %543 = math.tanh %542 : vector<8x32xf32>
    %cst_163 = arith.constant 5.000000e-01 : f32
    %544 = vector.broadcast %cst_163 : f32 to vector<8x32xf32>
    %545 = arith.mulf %544, %543 : vector<8x32xf32>
    %cst_164 = arith.constant 5.000000e-01 : f32
    %546 = vector.broadcast %cst_164 : f32 to vector<8x32xf32>
    %547 = arith.addf %545, %546 : vector<8x32xf32>
    %548 = vector.extract_strided_slice %500 {offsets = [0, 64], sizes = [8, 32], strides = [1, 1]} : vector<8x128xf32> to vector<8x32xf32>
    %549 = math.tanh %548 : vector<8x32xf32>
    %550 = vector.extract_strided_slice %500 {offsets = [0, 96], sizes = [8, 32], strides = [1, 1]} : vector<8x128xf32> to vector<8x32xf32>
    %cst_165 = arith.constant 5.000000e-01 : f32
    %551 = vector.broadcast %cst_165 : f32 to vector<8x32xf32>
    %552 = arith.mulf %551, %550 : vector<8x32xf32>
    %553 = math.tanh %552 : vector<8x32xf32>
    %cst_166 = arith.constant 5.000000e-01 : f32
    %554 = vector.broadcast %cst_166 : f32 to vector<8x32xf32>
    %555 = arith.mulf %554, %553 : vector<8x32xf32>
    %cst_167 = arith.constant 5.000000e-01 : f32
    %556 = vector.broadcast %cst_167 : f32 to vector<8x32xf32>
    %557 = arith.addf %555, %556 : vector<8x32xf32>
    %558 = arith.mulf %547, %490 : vector<8x32xf32>
    %559 = arith.mulf %539, %549 : vector<8x32xf32>
    %560 = arith.addf %558, %559 : vector<8x32xf32>
    %561 = math.tanh %560 : vector<8x32xf32>
    %562 = arith.mulf %557, %561 : vector<8x32xf32>
    %563 = tpu.concatenate %531, %562 in 1 : vector<8x32xf32>, vector<8x32xf32> -> vector<8x64xf32>
    %c0_168 = arith.constant 0 : index
    %c0_169 = arith.constant 0 : index
    %564 = vector.load %arg5[%c0_168, %c0_169] : memref<8x64xf32, #tpu.memory_space<vmem>>, vector<8x64xf32>
    tpu.vector_store %arg5[%c0_168, %c0_169], %563 {strides = array<i32>} : memref<8x64xf32, #tpu.memory_space<vmem>>, vector<8x64xf32>,
    return
  }
}

</mosaic_0001>

<bundles_post_ra>
// kernel: tpu_custom_call.1
= control target key start
LH: loop header
LB: loop body
LE: loop exit
PB: predicated region body
PF: predicated region fallthrough
CT: control target
= control target key end

     0   :  { %10 = vsyncpa [#allocation3], 0  ;;  %s1347_s0 = inlined_call_operand.vmem [shape: bf16[64,32], index: 0, kind: input, shape index: {}]   ;;  %s1348_s1 = inlined_call_operand.vmem [shape: bf16[32,256], index: 1, kind: input, shape index: {}]   ;;  %s1349_s2 = inlined_call_operand.vmem [shape: bf16[32,128], index: 2, kind: input, shape index: {}]   ;;  %s1350_s3 = inlined_call_operand.hbm [shape: bf16[32,128], index: 3, kind: input, shape index: {}]   ;;  %s1351_s4 = inlined_call_operand.vmem [shape: f32[1,256], index: 4, kind: input, shape index: {}]   ;;  %s1352_s5 = inlined_call_operand.hbm [shape: f32[8,64], index: 5, kind: output, shape index: {}]  }
   0x1   :  { %11 = vsyncpa [#allocation4], 0  ;;  %s22_s20 = sshll.u32 %s1350_s3, 4  ;;  %s1094_s21 = smov [#allocation2]   ;;  %s23_s20 = int_to_ptr.hbm [resolvable:$true] %s22_s20 }
   0x2   :  { %s24_s22 = sshll.u32 %s1094_s21, 4  ;;  %s1095_s23 = smov 64   ;;  %s25_s22 = int_to_ptr.vmem [resolvable:$true] %s24_s22 }
   0x3   :  { %s1096_s24 = smov 4  }
   0x4   :  { %30 = dma.hbm_to_vmem [thread:$0]  %s23_s20, 256, %s25_s22, [#allocation3], %s1095_s23, %s1095_s23, %s1096_s24  }
   0x5   :  { %1090 = dma.done.wait [#allocation3], 256  }
   0x6   :  { %1091 = vsyncadd [#allocation3], 4294967040  ;;  %v885_v0 = vld [vmem:[%s1348_s1 + $0x10] sm:$0xf]  ;;  %v936_v1 = vld [vmem:[%s1348_s1 + $0x14] sm:$0xf0] }
   0x7   :  { %v935_v2 = vld [vmem:[%s1348_s1 + $0x14] sm:$0xf]  ;;  %v886_v3 = vor.u32 %v936_v1, %v885_v0  ;;  %v887_v4 = vld [vmem:[%s1348_s1 + $0x18] sm:$0xf0]  ;;  %v877_v5 = vld [vmem:[%s1348_s1] sm:$0xf] }
   0x8   :  { %v934_v6 = vld [vmem:[%s1348_s1 + $0x4] sm:$0xf0]  ;;  %v890_v7 = vor.u32 %v935_v2, %v887_v4  ;;  %v933_v8 = vld [vmem:[%s1348_s1 + $0x4] sm:$0xf]  ;;  %v879_v9 = vld [vmem:[%s1348_s1 + $0x8] sm:$0xf0] }
   0x9   :  { %115 = vmatpush.bf16.msra.mxu0 %v886_v3  ;;  %v878_v10 = vor.u32 %v934_v6, %v877_v5  ;;  %v882_v11 = vor.u32 %v933_v8, %v879_v9  ;;  %v929_v12 = vld [vmem:[%s1347_s0] sm:$0xff]  ;;  %vm96_vm0 = vcmask 261120   ;;  %v930_v13 = vld [vmem:[%s1347_s0 + $0x8] sm:$0xff]  ;;  %v931_v14 = vld [vmem:[%s1347_s0 + $0x10] sm:$0xff]  ;;  %s849_s30 = sshll.u32 %s1352_s5, 4  ;;  %vm840_vm1 = vcmask 523264   ;;  %s850_s30 = int_to_ptr.hbm [resolvable:$true] %s849_s30 }
   0xa   :  { %144 = vmatpush.bf16.msra.mxu1 %v890_v7  ;;  %v932_v15 = vld [vmem:[%s1347_s0 + $0x18] sm:$0xff]  ;;  %v50_v16 = vld [vmem:[%s1351_s4] sm:$0x3]  ;;  %s1097_s0 = smov 32   ;;  %v1214_v62 = vld [vmem:[%s1349_s2 + $0x8] sm:$0xff] }
   0xb   :  { %v1181_v17 = vperm.slane %v50_v16, 0  ;;  %v53_v18 = vperm.slane %v50_v16, 1  ;;  %245 = vmatpush.bf16.msra.mxu2 %v1214_v62  ;;  %v1220_v63 = vld [vmem:[%s1349_s2] sm:$0xff]  ;;  %v1230_v3 = vld [vmem:[#allocation2 + $0x8] sm:$0xff]  ;;  %s1098_s2 = smov [#allocation5]  }
   0xc   :  { %276 = vmatpush.bf16.msra.mxu3 %v1230_v3  ;;  %v1233_v4 = vld [vmem:[#allocation2] sm:$0xff]  ;;  %s847_s28 = sshll.u32 %s1098_s2, 4  ;;  %s848_s28 = int_to_ptr.vmem [resolvable:$true] %s847_s28 }
   0xd   :  { %116 = vmatpush.bf16.msra.mxu0 %v878_v10 }
   0xe   :  { %145 = vmatpush.bf16.msra.mxu1 %v882_v11 }
   0xf   :  { %246 = vmatpush.bf16.msra.mxu2 %v1220_v63 }
  0x10   :  { %891 = vmatmul.msk.bf16.vlgmr.msra.gmra.mxu0 %vm96_vm0, %v929_v12  ;;  %277 = vmatpush.bf16.msra.mxu3 %v1233_v4 }
  0x11   :  { %895 = vmatmul.msk.bf16.vlgmr.msra.gmra.mxu1 %vm96_vm0, %v929_v12  ;;  %593 = vmatpush.bf16.msrb.mxu0 %v1214_v62 }
  0x12   :  { %612 = vmatpush.bf16.msrb.mxu1 %v1230_v3 }
  0x13   :  { %341 = vmatpush.bf16.msrb.mxu2 %v1214_v62 }
  0x14   :  { %360 = vmatpush.bf16.msrb.mxu3 %v1230_v3 }
  0x15   :  { %594 = vmatpush.bf16.msrb.mxu0 %v1220_v63 }
  0x16   :  { %613 = vmatpush.bf16.msrb.mxu1 %v1233_v4 }
  0x17   :  { %342 = vmatpush.bf16.msrb.mxu2 %v1220_v63 }
  0x18   :  { %361 = vmatpush.bf16.msrb.mxu3 %v1233_v4 }
  0x19   :  { %761 = vmatpush.bf16.msra.mxu0 %v1214_v62 }
  0x1a   :  { %780 = vmatpush.bf16.msra.mxu1 %v1230_v3 }
  0x1d   :  { %762 = vmatpush.bf16.msra.mxu0 %v1220_v63 }
  0x1e   :  { %781 = vmatpush.bf16.msra.mxu1 %v1233_v4 }
  0x20   :  { %892 = vmatmul.msk.bf16.gmra.mxu0 %vm96_vm0, %v930_v13 }
  0x21   :  { %896 = vmatmul.msk.bf16.gmra.mxu1 %vm96_vm0, %v930_v13 }
  0x30   :  { %893 = vmatmul.msk.bf16.gmra.mxu0 %vm96_vm0, %v931_v14 }
  0x31   :  { %897 = vmatmul.msk.bf16.gmra.mxu1 %vm96_vm0, %v931_v14 }
  0x40   :  { %894 = vmatmul.msk.bf16.gmra.mxu0 %vm96_vm0, %v932_v15 }
  0x41   :  { %898 = vmatmul.msk.bf16.gmra.mxu1 %vm96_vm0, %v932_v15 }
  0x8d   :  { %v118_v19 = vpop.f32.mrf.mxu0 }
  0x8e   :  { %v119_v20 = vadd.f32 %v118_v19, %v1181_v17  ;;  %v147_v21 = vpop.f32.mrf.mxu1 }
  0x8f   :  { %v1184_v22 = vadd.f32 %v147_v21, %v53_v18 }
  0x90   :  { %946 = vtanh.f32 %v119_v20  ;;  %v175_v39 = vmul.f32 0.5, %v119_v20 }
  0x95   :  { %v120_v7 = vpop.f32.mrf.mxu0 }
  0x96   :  { %v947_v23 = vpop.eup %946  ;;  %v149_v24 = vpop.f32.mrf.mxu1  ;;  %v121_v8 = vadd.f32 %v120_v7, %v1181_v17 }
  0x97   :  { %v1186_v25 = vadd.f32 %v149_v24, %v53_v18  ;;  %182 = vrot.lane.b32.xlu0 %v947_v23, %s1095_s23 }
  0x9e   :  { %v152_v26 = vpop.f32.mrf.mxu1 }
  0x9f   :  { %v1189_v27 = vadd.f32 %v152_v26, %v53_v18 }
  0xa6   :  { %v154_v28 = vpop.f32.mrf.mxu1 }
  0xa7   :  { %v1191_v29 = vadd.f32 %v154_v28, %v53_v18 }
  0xae   :  { %v157_v30 = vpop.f32.mrf.mxu1 }
  0xaf   :  { %v1193_v31 = vadd.f32 %v157_v30, %v53_v18 }
  0xb6   :  { %v159_v32 = vpop.f32.mrf.mxu1 }
  0xb7   :  { %v1195_v33 = vadd.f32 %v159_v32, %v53_v18 }
  0xbe   :  { %v162_v34 = vpop.f32.mrf.mxu1 }
  0xbf   :  { %v1197_v35 = vadd.f32 %v162_v34, %v53_v18 }
  0xc6   :  { %v164_v36 = vpop.f32.mrf.mxu1 }
  0xc7   :  { %v165_v37 = vadd.f32 %v164_v36, %v53_v18 }
  0xc9   :  { %948 = vtanh.f32 %v165_v37  ;;  %v197_v45 = vmul.f32 0.5, %v165_v37 }
  0xca   :  { %950 = vtanh.f32 %v175_v39 }
  0xcb   :  { %952 = vtanh.f32 %v197_v45 }
  0xcf   :  { %v949_v38 = vpop.eup %948 }
  0xd0   :  { %204 = vrot.lane.b32.xlu0 %v949_v38, %s1095_s23  ;;  %v951_v40 = vpop.eup %950 }
  0xd1   :  { %v177_v41 = vmul.f32 0.5, %v951_v40  ;;  %v953_v46 = vpop.eup %952 }
  0xd2   :  { %v199_v47 = vmul.f32 0.5, %v953_v46 }
  0xd3   :  { %v178_v42 = vadd.f32 0.5, %v177_v41 }
  0xd4   :  { %v200_v48 = vadd.f32 0.5, %v199_v47 }
  0xd5   :  { %v180_v51 = vmul.f32 0.0, %v178_v42 }
  0xd6   :  { %v202_v55 = vmul.f32 0.0, %v200_v48 }
 0x109   :  { %v183_v43 = vpop.permute.xlu0 %182 }
 0x10a   :  { %v185_v44 = vmul.f32 %v183_v43, %v178_v42 }
 0x10c   :  { %187 = vrot.lane.b32.xlu1 %v185_v44, %s1097_s0 }
 0x142   :  { %v205_v49 = vpop.permute.xlu0 %204 }
 0x143   :  { %v207_v50 = vmul.f32 %v205_v49, %v200_v48 }
 0x145   :  { %209 = vrot.lane.b32.xlu1 %v207_v50, %s1097_s0 }
 0x17e   :  { %v188_v52 = vpop.permute.xlu1 %187 }
 0x17f   :  { %v1202_v53 = vadd.f32 %v188_v52, %v180_v51  ;;  %v123_v52 = vpop.f32.mrf.mxu0 }
 0x181   :  { %954 = vtanh.f32 %v1202_v53 }
 0x187   :  { %v955_v54 = vpop.eup %954 }
 0x188   :  { %193 = vrot.lane.b32.xlu2 %v955_v54, %s1095_s23 }
 0x1b7   :  { %v210_v56 = vpop.permute.xlu1 %209 }
 0x1b8   :  { %v1206_v57 = vadd.f32 %v210_v56, %v202_v55 }
 0x1ba   :  { %956 = vtanh.f32 %v1206_v57 }
 0x1c0   :  { %v957_v58 = vpop.eup %956 }
 0x1c1   :  { %215 = vrot.lane.b32.xlu2 %v957_v58, %s1095_s23 }
 0x1e2   :  { %v194_v59 = vpop.permute.xlu2 %193 }
 0x1e3   :  { %v196_v60 = vmul.f32 %v194_v59, %v178_v42 }
 0x1e5   :  { %v219_v61 = vpack.c.bf16 %v196_v60, %v196_v60 }
 0x1e7   :  { %222 = vrot.lane.b32.xlu0 %v219_v61, %s1097_s0 }
 0x21b   :  { %v216_v0 = vpop.permute.xlu2 %215 }
 0x21c   :  { %v218_v1 = vmul.f32 %v216_v0, %v200_v48 }
 0x21e   :  { %v220_v2 = vpack.c.bf16 %v218_v1, %v218_v1 }
 0x220   :  { %253 = vrot.lane.b32.xlu1 %v220_v2, %s1097_s0 }
 0x259   :  { %v223_v5 = vpop.permute.xlu0 %222 }
 0x25a   :  { %907 = vmatmul.msk.bf16.vlgmr.msra.gmra.mxu2 %vm96_vm0, %v223_v5 }
 0x25b   :  { %425 = vmatpush.bf16.msra.mxu2 %v1214_v62 }
 0x25f   :  { %426 = vmatpush.bf16.msra.mxu2 %v1220_v63 }
 0x292   :  { %v254_v6 = vpop.permute.xlu1 %253 }
 0x293   :  { %916 = vmatmul.msk.bf16.vlgmr.msra.gmra.mxu3 %vm96_vm0, %v254_v6 }
 0x294   :  { %444 = vmatpush.bf16.msra.mxu3 %v1230_v3 }
 0x298   :  { %445 = vmatpush.bf16.msra.mxu3 %v1233_v4 }
 0x2dd   :  { %v248_v9 = vpop.f32.mrf.mxu2 }
 0x2de   :  { %v249_v10 = vadd.f32 %v248_v9, %v121_v8 }
 0x2e0   :  { %958 = vtanh.f32 %v249_v10  ;;  %v283_v18 = vmul.f32 0.5, %v249_v10 }
 0x2e5   :  { %v250_v11 = vpop.f32.mrf.mxu2 }
 0x2e6   :  { %v959_v12 = vpop.eup %958 }
 0x2e7   :  { %290 = vrot.lane.b32.xlu2 %v959_v12, %s1095_s23 }
 0x316   :  { %v279_v13 = vpop.f32.mrf.mxu3 }
 0x317   :  { %v280_v14 = vadd.f32 %v279_v13, %v1197_v35 }
 0x319   :  { %960 = vtanh.f32 %v280_v14  ;;  %v305_v26 = vmul.f32 0.5, %v280_v14 }
 0x31a   :  { %962 = vtanh.f32 %v283_v18 }
 0x31b   :  { %964 = vtanh.f32 %v305_v26 }
 0x31e   :  { %v281_v15 = vpop.f32.mrf.mxu3 }
 0x31f   :  { %v961_v16 = vpop.eup %960 }
 0x320   :  { %312 = vrot.lane.b32.xlu0 %v961_v16, %s1095_s23  ;;  %v963_v19 = vpop.eup %962 }
 0x321   :  { %v285_v20 = vmul.f32 0.5, %v963_v19  ;;  %v965_v28 = vpop.eup %964 }
 0x322   :  { %v307_v30 = vmul.f32 0.5, %v965_v28 }
 0x323   :  { %v286_v21 = vadd.f32 0.5, %v285_v20 }
 0x324   :  { %v308_v32 = vadd.f32 0.5, %v307_v30 }
 0x325   :  { %v288_v36 = vmul.f32 %v286_v21, %v1202_v53  ;;  %v124_v53 = vadd.f32 %v123_v52, %v1181_v17 }
 0x326   :  { %v310_v40 = vmul.f32 %v308_v32, %v1206_v57 }
 0x341   :  { %v291_v23 = vpop.permute.xlu2 %290 }
 0x342   :  { %v293_v24 = vmul.f32 %v291_v23, %v286_v21 }
 0x344   :  { %295 = vrot.lane.b32.xlu1 %v293_v24, %s1097_s0 }
 0x392   :  { %v313_v34 = vpop.permute.xlu0 %312 }
 0x393   :  { %v315_v35 = vmul.f32 %v313_v34, %v308_v32 }
 0x395   :  { %317 = vrot.lane.b32.xlu2 %v315_v35, %s1097_s0 }
 0x3b6   :  { %v296_v37 = vpop.permute.xlu1 %295 }
 0x3b7   :  { %v298_v38 = vadd.f32 %v296_v37, %v288_v36  ;;  %v125_v36 = vpop.f32.mrf.mxu0 }
 0x3b8   :  { %v126_v37 = vadd.f32 %v125_v36, %v1181_v17 }
 0x3b9   :  { %966 = vtanh.f32 %v298_v38 }
 0x3bf   :  { %v967_v39 = vpop.eup %966 }
 0x3c0   :  { %301 = vrot.lane.b32.xlu0 %v967_v39, %s1095_s23 }
 0x3ef   :  { %v318_v41 = vpop.permute.xlu2 %317 }
 0x3f0   :  { %v320_v42 = vadd.f32 %v318_v41, %v310_v40 }
 0x3f2   :  { %968 = vtanh.f32 %v320_v42 }
 0x3f8   :  { %v969_v43 = vpop.eup %968 }
 0x3f9   :  { %323 = vrot.lane.b32.xlu1 %v969_v43, %s1095_s23 }
 0x432   :  { %v302_v44 = vpop.permute.xlu0 %301 }
 0x433   :  { %v304_v45 = vmul.f32 %v302_v44, %v286_v21 }
 0x435   :  { %v327_v46 = vpack.c.bf16 %v304_v45, %v304_v45 }
 0x437   :  { %330 = vrot.lane.b32.xlu2 %v327_v46, %s1097_s0 }
 0x46b   :  { %v324_v47 = vpop.permute.xlu1 %323 }
 0x46c   :  { %v326_v48 = vmul.f32 %v324_v47, %v308_v32 }
 0x46e   :  { %v328_v49 = vpack.c.bf16 %v326_v48, %v326_v48 }
 0x470   :  { %349 = vrot.lane.b32.xlu0 %v328_v49, %s1097_s0 }
 0x491   :  { %v331_v50 = vpop.permute.xlu2 %330 }
 0x492   :  { %917 = vmatmul.msk.bf16.vlgmr.msrb.gmra.mxu2 %vm96_vm0, %v331_v50 }
 0x493   :  { %509 = vmatpush.bf16.msrb.mxu2 %v1214_v62 }
 0x497   :  { %510 = vmatpush.bf16.msrb.mxu2 %v1220_v63 }
 0x4e2   :  { %v350_v51 = vpop.permute.xlu0 %349 }
 0x4e3   :  { %918 = vmatmul.msk.bf16.vlgmr.msrb.gmra.mxu3 %vm96_vm0, %v350_v51 }
 0x4e4   :  { %528 = vmatpush.bf16.msrb.mxu3 %v1230_v3 }
 0x4e8   :  { %529 = vmatpush.bf16.msrb.mxu3 %v1233_v4 }
 0x515   :  { %v344_v54 = vpop.f32.mrf.mxu2 }
 0x516   :  { %v345_v55 = vadd.f32 %v344_v54, %v124_v53 }
 0x518   :  { %970 = vtanh.f32 %v345_v55  ;;  %v367_v0 = vmul.f32 0.5, %v345_v55 }
 0x51d   :  { %v346_v56 = vpop.f32.mrf.mxu2 }
 0x51e   :  { %v971_v57 = vpop.eup %970 }
 0x51f   :  { %374 = vrot.lane.b32.xlu1 %v971_v57, %s1095_s23 }
 0x566   :  { %v363_v58 = vpop.f32.mrf.mxu3 }
 0x567   :  { %v364_v59 = vadd.f32 %v363_v58, %v1195_v33 }
 0x569   :  { %972 = vtanh.f32 %v364_v59  ;;  %v389_v8 = vmul.f32 0.5, %v364_v59 }
 0x56a   :  { %974 = vtanh.f32 %v367_v0 }
 0x56b   :  { %976 = vtanh.f32 %v389_v8 }
 0x56e   :  { %v365_v60 = vpop.f32.mrf.mxu3 }
 0x56f   :  { %v973_v61 = vpop.eup %972 }
 0x570   :  { %396 = vrot.lane.b32.xlu2 %v973_v61, %s1095_s23  ;;  %v975_v1 = vpop.eup %974 }
 0x571   :  { %v369_v2 = vmul.f32 0.5, %v975_v1  ;;  %v977_v9 = vpop.eup %976 }
 0x572   :  { %v391_v10 = vmul.f32 0.5, %v977_v9  ;;  %v128_v9 = vpop.f32.mrf.mxu0 }
 0x573   :  { %v370_v5 = vadd.f32 0.5, %v369_v2 }
 0x574   :  { %v392_v11 = vadd.f32 0.5, %v391_v10  ;;  %v129_v10 = vadd.f32 %v128_v9, %v1181_v17 }
 0x575   :  { %v372_v13 = vmul.f32 %v370_v5, %v298_v38 }
 0x576   :  { %v394_v18 = vmul.f32 %v392_v11, %v320_v42 }
 0x591   :  { %v375_v6 = vpop.permute.xlu1 %374 }
 0x592   :  { %v377_v7 = vmul.f32 %v375_v6, %v370_v5 }
 0x594   :  { %379 = vrot.lane.b32.xlu0 %v377_v7, %s1097_s0 }
 0x5ca   :  { %v397_v33 = vpop.permute.xlu2 %396 }
 0x5cb   :  { %v399_v12 = vmul.f32 %v397_v33, %v392_v11 }
 0x5cd   :  { %401 = vrot.lane.b32.xlu1 %v399_v12, %s1097_s0 }
 0x606   :  { %v380_v14 = vpop.permute.xlu0 %379 }
 0x607   :  { %v382_v15 = vadd.f32 %v380_v14, %v372_v13 }
 0x609   :  { %978 = vtanh.f32 %v382_v15 }
 0x60f   :  { %v979_v16 = vpop.eup %978 }
 0x610   :  { %385 = vrot.lane.b32.xlu2 %v979_v16, %s1095_s23 }
 0x63f   :  { %v402_v19 = vpop.permute.xlu1 %401 }
 0x640   :  { %v404_v20 = vadd.f32 %v402_v19, %v394_v18 }
 0x642   :  { %980 = vtanh.f32 %v404_v20 }
 0x648   :  { %v981_v21 = vpop.eup %980 }
 0x649   :  { %407 = vrot.lane.b32.xlu0 %v981_v21, %s1095_s23 }
 0x66a   :  { %v386_v23 = vpop.permute.xlu2 %385 }
 0x66b   :  { %v388_v24 = vmul.f32 %v386_v23, %v370_v5 }
 0x66d   :  { %v411_v26 = vpack.c.bf16 %v388_v24, %v388_v24 }
 0x66f   :  { %414 = vrot.lane.b32.xlu1 %v411_v26, %s1097_s0 }
 0x6bb   :  { %v408_v28 = vpop.permute.xlu0 %407 }
 0x6bc   :  { %v410_v30 = vmul.f32 %v408_v28, %v392_v11 }
 0x6be   :  { %v412_v32 = vpack.c.bf16 %v410_v30, %v410_v30 }
 0x6c0   :  { %433 = vrot.lane.b32.xlu2 %v412_v32, %s1097_s0 }
 0x6e1   :  { %v415_v34 = vpop.permute.xlu1 %414 }
 0x6e2   :  { %919 = vmatmul.msk.bf16.vlgmr.msra.gmra.mxu2 %vm96_vm0, %v415_v34 }
 0x6e3   :  { %677 = vmatpush.bf16.msra.mxu2 %v1214_v62 }
 0x6e7   :  { %678 = vmatpush.bf16.msra.mxu2 %v1220_v63 }
 0x71a   :  { %v434_v35 = vpop.permute.xlu2 %433 }
 0x71b   :  { %920 = vmatmul.msk.bf16.vlgmr.msra.gmra.mxu3 %vm96_vm0, %v434_v35 }
 0x71c   :  { %696 = vmatpush.bf16.msra.mxu3 %v1230_v3 }
 0x720   :  { %697 = vmatpush.bf16.msra.mxu3 %v1233_v4 }
 0x765   :  { %v428_v38 = vpop.f32.mrf.mxu2 }
 0x766   :  { %v429_v39 = vadd.f32 %v428_v38, %v126_v37 }
 0x768   :  { %982 = vtanh.f32 %v429_v39  ;;  %v451_v3 = vmul.f32 0.5, %v429_v39 }
 0x76d   :  { %v430_v40 = vpop.f32.mrf.mxu2 }
 0x76e   :  { %v983_v41 = vpop.eup %982 }
 0x76f   :  { %458 = vrot.lane.b32.xlu0 %v983_v41, %s1095_s23 }
 0x79e   :  { %v447_v62 = vpop.f32.mrf.mxu3 }
 0x79f   :  { %v448_v63 = vadd.f32 %v447_v62, %v1193_v31 }
 0x7a1   :  { %984 = vtanh.f32 %v448_v63  ;;  %v473_v48 = vmul.f32 0.5, %v448_v63 }
 0x7a2   :  { %986 = vtanh.f32 %v451_v3 }
 0x7a3   :  { %988 = vtanh.f32 %v473_v48  ;;  %v130_v48 = vpop.f32.mrf.mxu0 }
 0x7a6   :  { %v449_v42 = vpop.f32.mrf.mxu3 }
 0x7a7   :  { %v985_v43 = vpop.eup %984 }
 0x7a8   :  { %480 = vrot.lane.b32.xlu1 %v985_v43, %s1095_s23  ;;  %v987_v4 = vpop.eup %986 }
 0x7a9   :  { %v453_v44 = vmul.f32 0.5, %v987_v4  ;;  %v989_v49 = vpop.eup %988 }
 0x7aa   :  { %v475_v50 = vmul.f32 0.5, %v989_v49 }
 0x7ab   :  { %v454_v45 = vadd.f32 0.5, %v453_v44  ;;  %v133_v49 = vpop.f32.mrf.mxu0 }
 0x7ac   :  { %v476_v51 = vadd.f32 0.5, %v475_v50 }
 0x7ad   :  { %v456_v53 = vmul.f32 %v454_v45, %v382_v15 }
 0x7ae   :  { %v478_v57 = vmul.f32 %v476_v51, %v404_v20 }
 0x7b3   :  { %v1306_v50 = vpop.f32.mrf.mxu0 }
 0x7e1   :  { %v459_v46 = vpop.permute.xlu0 %458 }
 0x7e2   :  { %v461_v47 = vmul.f32 %v459_v46, %v454_v45 }
 0x7e4   :  { %463 = vrot.lane.b32.xlu2 %v461_v47, %s1097_s0 }
 0x81a   :  { %v481_v31 = vpop.permute.xlu1 %480 }
 0x81b   :  { %v483_v52 = vmul.f32 %v481_v31, %v476_v51 }
 0x81d   :  { %485 = vrot.lane.b32.xlu0 %v483_v52, %s1097_s0 }
 0x83e   :  { %v464_v54 = vpop.permute.xlu2 %463 }
 0x83f   :  { %v466_v55 = vadd.f32 %v464_v54, %v456_v53 }
 0x841   :  { %990 = vtanh.f32 %v466_v55 }
 0x847   :  { %v991_v56 = vpop.eup %990 }
 0x848   :  { %469 = vrot.lane.b32.xlu1 %v991_v56, %s1095_s23 }
 0x88f   :  { %v486_v58 = vpop.permute.xlu0 %485 }
 0x890   :  { %v488_v59 = vadd.f32 %v486_v58, %v478_v57 }
 0x892   :  { %992 = vtanh.f32 %v488_v59 }
 0x898   :  { %v993_v60 = vpop.eup %992 }
 0x899   :  { %491 = vrot.lane.b32.xlu2 %v993_v60, %s1095_s23 }
 0x8ba   :  { %v470_v61 = vpop.permute.xlu1 %469 }
 0x8bb   :  { %v472_v0 = vmul.f32 %v470_v61, %v454_v45 }
 0x8bd   :  { %v495_v1 = vpack.c.bf16 %v472_v0, %v472_v0 }
 0x8bf   :  { %498 = vrot.lane.b32.xlu0 %v495_v1, %s1097_s0 }
 0x8f3   :  { %v492_v2 = vpop.permute.xlu2 %491 }
 0x8f4   :  { %v494_v5 = vmul.f32 %v492_v2, %v476_v51  ;;  %v131_v51 = vadd.f32 %v130_v48, %v1181_v17 }
 0x8f6   :  { %v496_v6 = vpack.c.bf16 %v494_v5, %v494_v5 }
 0x8f8   :  { %517 = vrot.lane.b32.xlu1 %v496_v6, %s1097_s0 }
 0x931   :  { %v499_v7 = vpop.permute.xlu0 %498 }
 0x932   :  { %921 = vmatmul.msk.bf16.vlgmr.msrb.gmra.mxu2 %vm96_vm0, %v499_v7 }
 0x96a   :  { %v518_v8 = vpop.permute.xlu1 %517 }
 0x96b   :  { %922 = vmatmul.msk.bf16.vlgmr.msrb.gmra.mxu3 %vm96_vm0, %v518_v8 }
 0x9b5   :  { %v512_v11 = vpop.f32.mrf.mxu2 }
 0x9b6   :  { %v513_v33 = vadd.f32 %v512_v11, %v129_v10 }
 0x9b8   :  { %994 = vtanh.f32 %v513_v33  ;;  %v535_v19 = vmul.f32 0.5, %v513_v33 }
 0x9bd   :  { %v514_v12 = vpop.f32.mrf.mxu2 }
 0x9be   :  { %v995_v13 = vpop.eup %994 }
 0x9bf   :  { %542 = vrot.lane.b32.xlu2 %v995_v13, %s1095_s23 }
 0x9ee   :  { %v531_v14 = vpop.f32.mrf.mxu3 }
 0x9ef   :  { %v532_v15 = vadd.f32 %v531_v14, %v1191_v29 }
 0x9f1   :  { %996 = vtanh.f32 %v532_v15  ;;  %v557_v28 = vmul.f32 0.5, %v532_v15 }
 0x9f2   :  { %998 = vtanh.f32 %v535_v19 }
 0x9f3   :  { %1000 = vtanh.f32 %v557_v28 }
 0x9f6   :  { %v533_v16 = vpop.f32.mrf.mxu3 }
 0x9f7   :  { %v997_v18 = vpop.eup %996 }
 0x9f8   :  { %564 = vrot.lane.b32.xlu0 %v997_v18, %s1095_s23  ;;  %v999_v20 = vpop.eup %998 }
 0x9f9   :  { %v537_v21 = vmul.f32 0.5, %v999_v20  ;;  %v1001_v30 = vpop.eup %1000 }
 0x9fa   :  { %v559_v32 = vmul.f32 0.5, %v1001_v30  ;;  %v134_v30 = vadd.f32 %v133_v49, %v1181_v17 }
 0x9fb   :  { %v538_v23 = vadd.f32 0.5, %v537_v21 }
 0x9fc   :  { %v560_v34 = vadd.f32 0.5, %v559_v32 }
 0x9fd   :  { %v540_v36 = vmul.f32 %v538_v23, %v466_v55 }
 0x9fe   :  { %v562_v40 = vmul.f32 %v560_v34, %v488_v59 }
 0xa19   :  { %v543_v24 = vpop.permute.xlu2 %542 }
 0xa1a   :  { %v545_v26 = vmul.f32 %v543_v24, %v538_v23 }
 0xa1c   :  { %547 = vrot.lane.b32.xlu1 %v545_v26, %s1097_s0 }
 0xa6a   :  { %v565_v29 = vpop.permute.xlu0 %564 }
 0xa6b   :  { %v567_v35 = vmul.f32 %v565_v29, %v560_v34 }
 0xa6d   :  { %569 = vrot.lane.b32.xlu2 %v567_v35, %s1097_s0 }
 0xa8e   :  { %v548_v37 = vpop.permute.xlu1 %547 }
 0xa8f   :  { %v550_v38 = vadd.f32 %v548_v37, %v540_v36 }
 0xa91   :  { %1002 = vtanh.f32 %v550_v38 }
 0xa97   :  { %v1003_v39 = vpop.eup %1002 }
 0xa98   :  { %553 = vrot.lane.b32.xlu0 %v1003_v39, %s1095_s23 }
 0xac7   :  { %v570_v41 = vpop.permute.xlu2 %569 }
 0xac8   :  { %v572_v62 = vadd.f32 %v570_v41, %v562_v40 }
 0xaca   :  { %1004 = vtanh.f32 %v572_v62 }
 0xad0   :  { %v1005_v63 = vpop.eup %1004 }
 0xad1   :  { %575 = vrot.lane.b32.xlu1 %v1005_v63, %s1095_s23 }
 0xb0a   :  { %v554_v42 = vpop.permute.xlu0 %553 }
 0xb0b   :  { %v556_v43 = vmul.f32 %v554_v42, %v538_v23 }
 0xb0d   :  { %v579_v3 = vpack.c.bf16 %v556_v43, %v556_v43 }
 0xb0f   :  { %582 = vrot.lane.b32.xlu2 %v579_v3, %s1097_s0 }
 0xb43   :  { %v576_v4 = vpop.permute.xlu1 %575 }
 0xb44   :  { %v578_v44 = vmul.f32 %v576_v4, %v560_v34 }
 0xb46   :  { %v580_v45 = vpack.c.bf16 %v578_v44, %v578_v44 }
 0xb48   :  { %601 = vrot.lane.b32.xlu0 %v580_v45, %s1097_s0 }
 0xb69   :  { %v583_v46 = vpop.permute.xlu2 %582 }
 0xb6a   :  { %923 = vmatmul.msk.bf16.vlgmr.msrb.gmra.mxu0 %vm96_vm0, %v583_v46 }
 0xbba   :  { %v602_v47 = vpop.permute.xlu0 %601 }
 0xbbb   :  { %924 = vmatmul.msk.bf16.vlgmr.msrb.gmra.mxu1 %vm96_vm0, %v602_v47 }
 0xbe7   :  { %v596_v31 = vpop.f32.mrf.mxu0 }
 0xbe8   :  { %v597_v52 = vadd.f32 %v596_v31, %v131_v51 }
 0xbea   :  { %1006 = vtanh.f32 %v597_v52  ;;  %v619_v59 = vmul.f32 0.5, %v597_v52 }
 0xbef   :  { %v598_v53 = vpop.f32.mrf.mxu0 }
 0xbf0   :  { %v1007_v54 = vpop.eup %1006 }
 0xbf1   :  { %626 = vrot.lane.b32.xlu1 %v1007_v54, %s1095_s23 }
 0xc38   :  { %v615_v55 = vpop.f32.mrf.mxu1 }
 0xc39   :  { %v616_v56 = vadd.f32 %v615_v55, %v1189_v27 }
 0xc3b   :  { %1008 = vtanh.f32 %v616_v56  ;;  %v641_v5 = vmul.f32 0.5, %v616_v56 }
 0xc3c   :  { %1010 = vtanh.f32 %v619_v59 }
 0xc3d   :  { %1012 = vtanh.f32 %v641_v5 }
 0xc40   :  { %v617_v57 = vpop.f32.mrf.mxu1 }
 0xc41   :  { %v1009_v58 = vpop.eup %1008 }
 0xc42   :  { %648 = vrot.lane.b32.xlu2 %v1009_v58, %s1095_s23  ;;  %v1011_v60 = vpop.eup %1010 }
 0xc43   :  { %v621_v61 = vmul.f32 0.5, %v1011_v60  ;;  %v1013_v6 = vpop.eup %1012 }
 0xc44   :  { %v643_v7 = vmul.f32 0.5, %v1013_v6 }
 0xc45   :  { %v622_v0 = vadd.f32 0.5, %v621_v61 }
 0xc46   :  { %v644_v8 = vadd.f32 0.5, %v643_v7 }
 0xc47   :  { %v624_v10 = vmul.f32 %v622_v0, %v550_v38 }
 0xc48   :  { %v646_v13 = vmul.f32 %v644_v8, %v572_v62 }
 0xc63   :  { %v627_v1 = vpop.permute.xlu1 %626 }
 0xc64   :  { %v629_v2 = vmul.f32 %v627_v1, %v622_v0  ;;  %v136_v1 = vadd.f32 %v1306_v50, %v1181_v17 }
 0xc66   :  { %631 = vrot.lane.b32.xlu0 %v629_v2, %s1097_s0 }
 0xc9c   :  { %v649_v27 = vpop.permute.xlu2 %648 }
 0xc9d   :  { %v651_v9 = vmul.f32 %v649_v27, %v644_v8 }
 0xc9f   :  { %653 = vrot.lane.b32.xlu1 %v651_v9, %s1097_s0 }
 0xcd8   :  { %v632_v11 = vpop.permute.xlu0 %631 }
 0xcd9   :  { %v634_v33 = vadd.f32 %v632_v11, %v624_v10 }
 0xcdb   :  { %1014 = vtanh.f32 %v634_v33 }
 0xce1   :  { %v1015_v12 = vpop.eup %1014 }
 0xce2   :  { %637 = vrot.lane.b32.xlu2 %v1015_v12, %s1095_s23 }
 0xd11   :  { %v654_v14 = vpop.permute.xlu1 %653 }
 0xd12   :  { %v656_v15 = vadd.f32 %v654_v14, %v646_v13 }
 0xd14   :  { %1016 = vtanh.f32 %v656_v15 }
 0xd1a   :  { %v1017_v16 = vpop.eup %1016 }
 0xd1b   :  { %659 = vrot.lane.b32.xlu0 %v1017_v16, %s1095_s23 }
 0xd3c   :  { %v638_v18 = vpop.permute.xlu2 %637 }
 0xd3d   :  { %v640_v19 = vmul.f32 %v638_v18, %v622_v0 }
 0xd3f   :  { %v663_v20 = vpack.c.bf16 %v640_v19, %v640_v19 }
 0xd41   :  { %666 = vrot.lane.b32.xlu1 %v663_v20, %s1097_s0 }
 0xd8d   :  { %v660_v21 = vpop.permute.xlu0 %659 }
 0xd8e   :  { %v662_v23 = vmul.f32 %v660_v21, %v644_v8 }
 0xd90   :  { %v664_v24 = vpack.c.bf16 %v662_v23, %v662_v23 }
 0xd92   :  { %685 = vrot.lane.b32.xlu2 %v664_v24, %s1097_s0 }
 0xdb3   :  { %v667_v26 = vpop.permute.xlu1 %666 }
 0xdb4   :  { %925 = vmatmul.msk.bf16.vlgmr.msra.gmra.mxu2 %vm96_vm0, %v667_v26 }
 0xdec   :  { %v686_v28 = vpop.permute.xlu2 %685 }
 0xded   :  { %926 = vmatmul.msk.bf16.vlgmr.msra.gmra.mxu3 %vm96_vm0, %v686_v28 }
 0xe37   :  { %v680_v32 = vpop.f32.mrf.mxu2 }
 0xe38   :  { %v681_v34 = vadd.f32 %v680_v32, %v134_v30 }
 0xe3a   :  { %1018 = vtanh.f32 %v681_v34  ;;  %v703_v40 = vmul.f32 0.5, %v681_v34 }
 0xe3f   :  { %v682_v29 = vpop.f32.mrf.mxu2 }
 0xe40   :  { %v1019_v35 = vpop.eup %1018 }
 0xe41   :  { %710 = vrot.lane.b32.xlu0 %v1019_v35, %s1095_s23 }
 0xe70   :  { %v699_v36 = vpop.f32.mrf.mxu3 }
 0xe71   :  { %v700_v37 = vadd.f32 %v699_v36, %v1186_v25 }
 0xe73   :  { %1020 = vtanh.f32 %v700_v37  ;;  %v725_v3 = vmul.f32 0.5, %v700_v37 }
 0xe74   :  { %1022 = vtanh.f32 %v703_v40 }
 0xe75   :  { %1024 = vtanh.f32 %v725_v3 }
 0xe78   :  { %v701_v38 = vpop.f32.mrf.mxu3 }
 0xe79   :  { %v1021_v39 = vpop.eup %1020 }
 0xe7a   :  { %732 = vrot.lane.b32.xlu1 %v1021_v39, %s1095_s23  ;;  %v1023_v41 = vpop.eup %1022 }
 0xe7b   :  { %v705_v62 = vmul.f32 0.5, %v1023_v41  ;;  %v1025_v4 = vpop.eup %1024 }
 0xe7c   :  { %v727_v44 = vmul.f32 0.5, %v1025_v4 }
 0xe7d   :  { %v706_v63 = vadd.f32 0.5, %v705_v62 }
 0xe7e   :  { %v728_v45 = vadd.f32 0.5, %v727_v44 }
 0xe7f   :  { %v708_v47 = vmul.f32 %v706_v63, %v634_v33 }
 0xe80   :  { %v730_v31 = vmul.f32 %v728_v45, %v656_v15 }
 0xeb3   :  { %v711_v42 = vpop.permute.xlu0 %710 }
 0xeb4   :  { %v713_v43 = vmul.f32 %v711_v42, %v706_v63 }
 0xeb6   :  { %715 = vrot.lane.b32.xlu2 %v713_v43, %s1097_s0 }
 0xeec   :  { %v733_v25 = vpop.permute.xlu1 %732 }
 0xeed   :  { %v735_v46 = vmul.f32 %v733_v25, %v728_v45 }
 0xeef   :  { %737 = vrot.lane.b32.xlu0 %v735_v46, %s1097_s0 }
 0xf10   :  { %v716_v48 = vpop.permute.xlu2 %715 }
 0xf11   :  { %v718_v49 = vadd.f32 %v716_v48, %v708_v47 }
 0xf13   :  { %1026 = vtanh.f32 %v718_v49 }
 0xf19   :  { %v1027_v51 = vpop.eup %1026 }
 0xf1a   :  { %721 = vrot.lane.b32.xlu1 %v1027_v51, %s1095_s23 }
 0xf61   :  { %v738_v52 = vpop.permute.xlu0 %737 }
 0xf62   :  { %v740_v53 = vadd.f32 %v738_v52, %v730_v31 }
 0xf64   :  { %1028 = vtanh.f32 %v740_v53 }
 0xf6a   :  { %v1029_v54 = vpop.eup %1028 }
 0xf6b   :  { %743 = vrot.lane.b32.xlu2 %v1029_v54, %s1095_s23 }
 0xf8c   :  { %v722_v55 = vpop.permute.xlu1 %721 }
 0xf8d   :  { %v724_v56 = vmul.f32 %v722_v55, %v706_v63 }
 0xf8f   :  { %v747_v57 = vpack.c.bf16 %v724_v56, %v724_v56 }
 0xf91   :  { %750 = vrot.lane.b32.xlu0 %v747_v57, %s1097_s0 }
 0xfc5   :  { %v744_v58 = vpop.permute.xlu2 %743 }
 0xfc6   :  { %v746_v59 = vmul.f32 %v744_v58, %v728_v45 }
 0xfc8   :  { %v748_v60 = vpack.c.bf16 %v746_v59, %v746_v59 }
 0xfca   :  { %769 = vrot.lane.b32.xlu1 %v748_v60, %s1097_s0 }
0x1003   :  { %v751_v61 = vpop.permute.xlu0 %750 }
0x1004   :  { %927 = vmatmul.msk.bf16.vlgmr.msra.gmra.mxu0 %vm96_vm0, %v751_v61 }
0x103c   :  { %v770_v0 = vpop.permute.xlu1 %769 }
0x103d   :  { %928 = vmatmul.msk.bf16.vlgmr.msra.gmra.mxu1 %vm96_vm0, %v770_v0 }
0x1081   :  { %v764_v2 = vpop.f32.mrf.mxu0 }
0x1082   :  { %v765_v5 = vadd.f32 %v764_v2, %v136_v1 }
0x1084   :  { %1030 = vtanh.f32 %v765_v5  ;;  %v787_v11 = vmul.f32 0.5, %v765_v5 }
0x1089   :  { %v766_v6 = vpop.f32.mrf.mxu0 }
0x108a   :  { %v1031_v7 = vpop.eup %1030 }
0x108b   :  { %794 = vrot.lane.b32.xlu2 %v1031_v7, %s1095_s23 }
0x10ba   :  { %v783_v8 = vpop.f32.mrf.mxu1 }
0x10bb   :  { %v784_v27 = vadd.f32 %v783_v8, %v1184_v22 }
0x10bd   :  { %1032 = vtanh.f32 %v784_v27  ;;  %v809_v14 = vmul.f32 0.5, %v784_v27 }
0x10be   :  { %1034 = vtanh.f32 %v787_v11 }
0x10bf   :  { %1036 = vtanh.f32 %v809_v14 }
0x10c2   :  { %v785_v9 = vpop.f32.mrf.mxu1 }
0x10c3   :  { %v1033_v10 = vpop.eup %1032 }
0x10c4   :  { %816 = vrot.lane.b32.xlu0 %v1033_v10, %s1095_s23  ;;  %v1035_v33 = vpop.eup %1034 }
0x10c5   :  { %v789_v12 = vmul.f32 0.5, %v1035_v33  ;;  %v1037_v15 = vpop.eup %1036 }
0x10c6   :  { %v811_v16 = vmul.f32 0.5, %v1037_v15 }
0x10c7   :  { %v790_v17 = vadd.f32 0.5, %v789_v12 }
0x10c8   :  { %v812_v18 = vadd.f32 0.5, %v811_v16 }
0x10c9   :  { %v792_v20 = vmul.f32 %v790_v17, %v718_v49 }
0x10ca   :  { %v814_v26 = vmul.f32 %v812_v18, %v740_v53 }
0x10e5   :  { %v795_v50 = vpop.permute.xlu2 %794 }
0x10e6   :  { %v797_v13 = vmul.f32 %v795_v50, %v790_v17 }
0x10e8   :  { %799 = vrot.lane.b32.xlu1 %v797_v13, %s1097_s0 }
0x1136   :  { %v817_v22 = vpop.permute.xlu0 %816 }
0x1137   :  { %v819_v19 = vmul.f32 %v817_v22, %v812_v18 }
0x1139   :  { %821 = vrot.lane.b32.xlu2 %v819_v19, %s1097_s0 }
0x115a   :  { %v800_v21 = vpop.permute.xlu1 %799 }
0x115b   :  { %v802_v23 = vadd.f32 %v800_v21, %v792_v20 }
0x115d   :  { %1038 = vtanh.f32 %v802_v23 }
0x1163   :  { %v1039_v24 = vpop.eup %1038 }
0x1164   :  { %805 = vrot.lane.b32.xlu0 %v1039_v24, %s1095_s23 }
0x1193   :  { %v822_v28 = vpop.permute.xlu2 %821 }
0x1194   :  { %v824_v30 = vadd.f32 %v822_v28, %v814_v26 }
0x1196   :  { %1040 = vtanh.f32 %v824_v30 }
0x119c   :  { %v1041_v32 = vpop.eup %1040 }
0x119d   :  { %827 = vrot.lane.b32.xlu1 %v1041_v32, %s1095_s23 }
0x11d6   :  { %v806_v34 = vpop.permute.xlu0 %805 }
0x11d7   :  { %v808_v29 = vmul.f32 %v806_v34, %v790_v17 }
0x11d9   :  { %832 = vrot.lane.b32.xlu2 %v808_v29, %s1097_s0 }
0x120f   :  { %v828_v35 = vpop.permute.xlu1 %827 }
0x1210   :  { %v830_v36 = vmul.f32 %v828_v35, %v812_v18 }
0x1212   :  { %836 = vrot.lane.b32.xlu0 %v830_v36, %s1095_s23 }
0x1233   :  { %v833_v37 = vpop.permute.xlu2 %832 }
0x1284   :  { %v837_v38 = vpop.permute.xlu0 %836 }
0x1285   :  { %v839_v39 = vsel %vm96_vm0, %v833_v37, %v837_v38 }
0x1286   :  { %841 = vst.msk [vmem:[#allocation5] sm:$0xff] %vm840_vm1, %v839_v39 }
0x1287   :  { %852 = dma.vmem_to_hbm [thread:$0]  %s848_s28, 128, %s850_s30, [#allocation4]  }
0x1288   :  { %1092 = dma.done.wait [#allocation4], 128  }
0x1289   :  { %1093 = vsyncadd [#allocation4], 4294967168 }
0x128a   :  { %857 = vsyncpa [#allocation3], 1 }
0x128b   :  { %858 = vsyncpa [#allocation4], 1 }

</bundles_post_ra>
